<compile_context>
chip_gen: v7x
topology: tpu7x:2x2x1
jax: 0.10.0
libtpu: 0.0.40
codegen_flags: <defaults>
</compile_context>

<pallas_src>
import functools
import math

import jax
import jax.numpy as jnp
from jax.experimental import pallas as pl
from jax.experimental.pallas import tpu as pltpu


# ---------------------------------------------------------------------------
# Helpers
# ---------------------------------------------------------------------------
def _round_up(x, m):
    return ((x + m - 1) // m) * m


def _pack_edge_weight(w_in, w_out, H, Hp, dtype):
    """x @ W layout, padded; columns [0:Hp) -> edge_in, [Hp:2Hp) -> edge_out."""
    out = jnp.zeros((Hp, 2 * Hp), dtype)
    out = out.at[:H, :H].set(w_in.T.astype(dtype))
    out = out.at[:H, Hp:Hp + H].set(w_out.T.astype(dtype))
    return out


def _pack_gate_weight(w, H, Hp, dtype):
    """w: (H, 3H) in x@W layout.  Gate g occupies columns [g*Hp, g*Hp+H)."""
    out = jnp.zeros((Hp, 3 * Hp), dtype)
    for g in range(3):
        out = out.at[:H, g * Hp:g * Hp + H].set(
            w[:, g * H:(g + 1) * H].astype(dtype))
    return out


def _pack_biases(params, H, Hp):
    """Fold b_iah/b_oah through w_ih and merge with b_ih/b_hh into per-gate rows.

    row 0: [b_edge_in | b_edge_out]   (2Hp wide)
    row 1: reset-gate bias   (gi_r + gh_r biases combined)
    row 2: update-gate bias  (gi_i + gh_i biases combined)
    row 3: new-gate bias, input side  (gi_n)
    row 4: new-gate bias, hidden side (gh_n)
    """
    f32 = jnp.float32
    w_ih = params["w_ih"].astype(f32)                     # (3H, 2H)
    wih_in = w_ih[:, :H].T                                # (H, 3H)
    wih_out = w_ih[:, H:].T                               # (H, 3H)
    gi_bias = (params["b_iah"].astype(f32) @ wih_in
               + params["b_oah"].astype(f32) @ wih_out
               + params["b_ih"].astype(f32))              # (3H,)
    b_hh = params["b_hh"].astype(f32)                     # (3H,)

    slab = jnp.zeros((8, 2 * Hp), f32)
    slab = slab.at[0, :H].set(params["linear_edge_in_b"].astype(f32))
    slab = slab.at[0, Hp:Hp + H].set(params["linear_edge_out_b"].astype(f32))
    slab = slab.at[1, :H].set(gi_bias[:H] + b_hh[:H])
    slab = slab.at[2, :H].set(gi_bias[H:2 * H] + b_hh[H:2 * H])
    slab = slab.at[3, :H].set(gi_bias[2 * H:])
    slab = slab.at[4, :H].set(b_hh[2 * H:])
    return slab


def _pick_bt(B, S, Hp, *, target_rows=256, budget_bytes=24 << 20):
    """Sessions per grid program.

    Prefer the smallest bt with bt*S >= 256 (fills the 256-wide MXU on v6e/v7x
    while keeping several programs for v7x's two TensorCores); otherwise the
    largest bt that fits the VMEM budget.  Budget is sized to also hold under
    v5e's 16 MiB scoped default / v7x's 64 MiB physical once vmem_limit_bytes
    is declared (see CompilerParams below).
    """
    # Double-buffered constant residency: 4 bf16 weight slabs + f32 bias slab.
    weight_bytes = 2 * (11 * Hp * Hp * 2 + 8 * 2 * Hp * 4)

    def block_bytes(bt):
        R = bt * S
        a = 2 * 2 * R * R * 2        # A_in/A_out block-diag blocks, dbl-buf, bf16
        io = 2 * 2 * R * Hp * 4      # hidden in + out blocks, dbl-buf, f32
        tmp = 14 * R * Hp * 4        # live in-kernel temporaries (generous)
        return a + io + tmp

    cands = [bt for bt in range(1, B + 1)
             if B % bt == 0 and ((bt * S) % 8 == 0 or bt == B)]
    fits = [bt for bt in cands if weight_bytes + block_bytes(bt) <= budget_bytes]
    if not fits:
        return cands[0]
    for bt in fits:
        if bt * S >= target_rows:
            return bt
    return fits[-1]


# ---------------------------------------------------------------------------
# GNN kernel: bt sessions per grid program, `step` gated-GRU iterations.
# ---------------------------------------------------------------------------
def _gnn_kernel(a_in_ref, a_out_ref, h_ref, w_edge_ref, w_in_ref, w_out_ref,
                w_hh_ref, bias_ref, out_ref, *, step, norm):
    R, Hp = h_ref.shape
    f32 = jnp.float32
    cdt = w_edge_ref.dtype                      # matmul compute dtype (bf16)

    h = h_ref[...].astype(f32)                  # (R, Hp), padded cols are zero
    if norm:
        # Row-wise L2 normalization of the gathered embedding rows (EUP rsqrt).
        sumsq = jnp.sum(h * h, axis=-1, keepdims=True)
        h = h * jax.lax.rsqrt(sumsq + 1e-12)

    # Tiny fused bias rows (loaded once).
    b_edge = bias_ref[0:1, :]                   # (1, 2Hp)
    b_r = bias_ref[1:2, :Hp]
    b_z = bias_ref[2:3, :Hp]
    b_ni = bias_ref[3:4, :Hp]
    b_nh = bias_ref[4:5, :Hp]

    def dot(a, b):
        return jnp.dot(a, b, preferred_element_type=f32)

    def cell(h):
        hc = h.astype(cdt)
        # Edge transforms fused into one matmul: (R,Hp) @ (Hp,2Hp).
        eo = dot(hc, w_edge_ref[...]) + b_edge
        ein = eo[:, :Hp].astype(cdt)
        eout = eo[:, Hp:].astype(cdt)
        # Graph propagation: ONE dense block-diagonal matmul per direction.
        inp_in = dot(a_in_ref[...], ein).astype(cdt)      # (R, Hp)
        inp_out = dot(a_out_ref[...], eout).astype(cdt)   # (R, Hp)

        def gate_pre(g):
            lo, hi = g * Hp, (g + 1) * Hp
            return (dot(inp_in, w_in_ref[:, lo:hi])
                    + dot(inp_out, w_out_ref[:, lo:hi])
                    + dot(hc, w_hh_ref[:, lo:hi]))

        # Per-gate computation (128-lane-aligned weight slices, no 3Hp temporaries).
        r = jax.nn.sigmoid(gate_pre(0) + b_r)
        z = jax.nn.sigmoid(gate_pre(1) + b_z)
        i_n = (dot(inp_in, w_in_ref[:, 2 * Hp:])
               + dot(inp_out, w_out_ref[:, 2 * Hp:]) + b_ni)
        h_n = dot(hc, w_hh_ref[:, 2 * Hp:]) + b_nh
        n = jnp.tanh(i_n + r * h_n)
        return n + z * (h - n)

    if step <= 4:
        for _ in range(step):                   # unrolled: LLO sees the body
            h = cell(h)
    else:
        h = jax.lax.fori_loop(0, step, lambda _, hh: cell(hh), h, unroll=True)

    out_ref[...] = h.astype(out_ref.dtype)      # lane-dense (R, Hp) store


def gnn_forward(A, hidden, params, *, step=1, norm=True,
                feature_dim=None, compute_dtype=jnp.bfloat16):
    B, S, Hin = hidden.shape
    H = feature_dim if feature_dim is not None else Hin
    Hp = _round_up(H, 128)
    assert A.shape == (B, S, 2 * S)
    dtype = hidden.dtype

    # Accept either an un-padded (B,S,H) or an already padded (B,S,Hp) gather.
    if Hin == Hp:
        hidden_p = hidden
    else:
        assert Hin == H
        hidden_p = jnp.zeros((B, S, Hp), dtype).at[:, :, :H].set(hidden)
    hidden2d = hidden_p.reshape(B * S, Hp)      # free reshape; rows = b*S + s

    bt = _pick_bt(B, S, Hp)
    G = B // bt
    R = bt * S

    # Block-diagonal adjacency per grid program (bf16): wrapper-side scatter so
    # the kernel does a single dense (R,R)@(R,Hp) matmul per direction.
    A_in = A[:, :, :S].astype(compute_dtype).reshape(G, bt, S, S)
    A_out = A[:, :, S:].astype(compute_dtype).reshape(G, bt, S, S)
    eye = jnp.eye(bt, dtype=compute_dtype)

    def blockdiag(x):
        return jnp.einsum("gbij,bc->gbicj", x, eye).reshape(G, R, R)

    A_in_bd = blockdiag(A_in)
    A_out_bd = blockdiag(A_out)

    # Packed / padded bf16 weight slabs (gate columns on 128-lane boundaries).
    w_edge = _pack_edge_weight(params["linear_edge_in_w"],
                               params["linear_edge_out_w"], H, Hp, compute_dtype)
    w_ih = params["w_ih"]                                   # (3H, 2H)
    w_in = _pack_gate_weight(w_ih[:, :H].T, H, Hp, compute_dtype)
    w_out = _pack_gate_weight(w_ih[:, H:].T, H, Hp, compute_dtype)
    w_hh = _pack_gate_weight(params["w_hh"].T, H, Hp, compute_dtype)
    biases = _pack_biases(params, H, Hp)                    # (8, 2Hp) f32

    kernel = functools.partial(_gnn_kernel, step=step, norm=norm)
    full = lambda shape: pl.BlockSpec(shape, lambda i: (0,) * len(shape))

    out2d = pl.pallas_call(
        kernel,
        out_shape=jax.ShapeDtypeStruct((B * S, Hp), dtype),
        grid=(G,),
        in_specs=[
            pl.BlockSpec((None, R, R), lambda i: (i, 0, 0)),   # A_in block-diag
            pl.BlockSpec((None, R, R), lambda i: (i, 0, 0)),   # A_out block-diag
            pl.BlockSpec((R, Hp), lambda i: (i, 0)),           # hidden rows
            full((Hp, 2 * Hp)),                                # packed edge weights
            full((Hp, 3 * Hp)),                                # w_ih (input_in half)
            full((Hp, 3 * Hp)),                                # w_ih (input_out half)
            full((Hp, 3 * Hp)),                                # w_hh
            full((8, 2 * Hp)),                                 # fused bias slab
        ],
        out_specs=pl.BlockSpec((R, Hp), lambda i: (i, 0)),
        compiler_params=pltpu.CompilerParams(
            dimension_semantics=("parallel",),
            vmem_limit_bytes=32 << 20),
    )(A_in_bd, A_out_bd, hidden2d, w_edge, w_in, w_out, w_hh, biases)

    out = out2d.reshape(B, S, Hp)
    return out[:, :, :H] if Hp != H else out


# ---------------------------------------------------------------------------
# SessionGraph.forward
# ---------------------------------------------------------------------------
def session_graph_forward(inputs, A, params, *, step=1, norm=True,
                          compute_dtype=jnp.bfloat16):
    emb = params["embedding"]                               # (n_node, H)
    H = emb.shape[1]
    Hp = _round_up(H, 128)
    if Hp != H:
        # Pad the table once so jnp.take produces the padded layout directly
        # (no (B,S,H)->(B,S,Hp) activation round trip around the kernel).
        emb = jnp.zeros((emb.shape[0], Hp), emb.dtype).at[:, :H].set(emb)
    hidden = jnp.take(emb, inputs, axis=0)                  # (B, S, Hp)
    # L2 normalization of the table commutes with the gather -> fused in-kernel.
    return gnn_forward(A, hidden, params, step=step, norm=norm,
                       feature_dim=H, compute_dtype=compute_dtype)


# Pure-JAX f32 reference for sanity checking ---------------------------------
def _reference(inputs, A, params, *, step=1, norm=True):
    emb = params["embedding"]
    if norm:
        emb = emb / jnp.linalg.norm(emb, axis=1, keepdims=True)
    h = emb[inputs]
    B, S, H = h.shape
    for _ in range(step):
        ein = h @ params["linear_edge_in_w"].T + params["linear_edge_in_b"]
        eout = h @ params["linear_edge_out_w"].T + params["linear_edge_out_b"]
        input_in = jnp.einsum("bij,bjh->bih", A[:, :, :S], ein) + params["b_iah"]
        input_out = jnp.einsum("bij,bjh->bih", A[:, :, S:], eout) + params["b_oah"]
        inp = jnp.concatenate([input_in, input_out], axis=2)
        gi = inp @ params["w_ih"].T + params["b_ih"]
        gh = h @ params["w_hh"].T + params["b_hh"]
        i_r, i_i, i_n = jnp.split(gi, 3, axis=2)
        h_r, h_i, h_n = jnp.split(gh, 3, axis=2)
        r = jax.nn.sigmoid(i_r + h_r)
        z = jax.nn.sigmoid(i_i + h_i)
        n = jnp.tanh(i_n + r * h_n)
        h = n + z * (h - n)
    return h


if __name__ == "__main__":
    B, S, H, N_NODE, STEP = 8, 8, 32, 50, 1
    stdv = 1.0 / math.sqrt(H)

    key = jax.random.PRNGKey(0)
    keys = jax.random.split(key, 16)
    u = lambda k, shape: jax.random.uniform(k, shape, jnp.float32, -stdv, stdv)

    params = {
        "embedding": u(keys[0], (N_NODE, H)),
        "w_ih": u(keys[1], (3 * H, 2 * H)),
        "w_hh": u(keys[2], (3 * H, H)),
        "b_ih": u(keys[3], (3 * H,)),
        "b_hh": u(keys[4], (3 * H,)),
        "b_iah": u(keys[5], (H,)),
        "b_oah": u(keys[6], (H,)),
        "linear_edge_in_w": u(keys[7], (H, H)),
        "linear_edge_in_b": u(keys[8], (H,)),
        "linear_edge_out_w": u(keys[9], (H, H)),
        "linear_edge_out_b": u(keys[10], (H,)),
    }

    inputs = jax.random.randint(keys[11], (B, S), 0, N_NODE, dtype=jnp.int32)
    A = jax.random.uniform(keys[12], (B, S, 2 * S), jnp.float32, 0.0, 1.0)

    out = session_graph_forward(inputs, A, params, step=STEP, norm=True)
    out = jax.block_until_ready(out)

    ref = _reference(inputs, A, params, step=STEP, norm=True)
    assert out.shape == (B, S, H)
    max_err = float(jnp.max(jnp.abs(out - ref)))
    # bf16 MXU operands vs f32 reference: relaxed tolerance.
    assert max_err < 5e-2, f"mismatch vs reference (max abs err {max_err})"

    # TODO(synk): compute_scores / loss / optimizer are training-side and not
    # part of SessionGraph.forward, so they are intentionally not implemented.
    print("KERNEL_OK")
</pallas_src>

<mosaic_0001>
module attributes {stable_mosaic.version = 11 : i64} {
  func.func @_gnn_kernel(%arg0: i32, %arg1: memref<1x64x64xbf16, #tpu.memory_space<vmem>>, %arg2: memref<1x64x64xbf16, #tpu.memory_space<vmem>>, %arg3: memref<64x128xf32, #tpu.memory_space<vmem>>, %arg4: memref<128x256xbf16, #tpu.memory_space<vmem>>, %arg5: memref<128x384xbf16, #tpu.memory_space<vmem>>, %arg6: memref<128x384xbf16, #tpu.memory_space<vmem>>, %arg7: memref<128x384xbf16, #tpu.memory_space<vmem>>, %arg8: memref<8x256xf32, #tpu.memory_space<vmem>>, %arg9: memref<64x128xf32, #tpu.memory_space<vmem>>) attributes {dimension_semantics = [#tpu.dimension_semantics<parallel>], iteration_bounds = array<i64: 1>, scalar_prefetch = 0 : i64, scratch_operands = 0 : i64, tpu.core_type = #tpu.core_type<tc>, window_params = [{transform_indices = @transform_0, window_bounds = array<i64: 1, 64, 64>}, {transform_indices = @transform_1, window_bounds = array<i64: 1, 64, 64>}, {transform_indices = @transform_2, window_bounds = array<i64: 64, 128>}, {pipeline_mode = #tpu.pipeline_mode<synchronous>, transform_indices = @transform_3, window_bounds = array<i64: 128, 256>}, {pipeline_mode = #tpu.pipeline_mode<synchronous>, transform_indices = @transform_4, window_bounds = array<i64: 128, 384>}, {pipeline_mode = #tpu.pipeline_mode<synchronous>, transform_indices = @transform_5, window_bounds = array<i64: 128, 384>}, {pipeline_mode = #tpu.pipeline_mode<synchronous>, transform_indices = @transform_6, window_bounds = array<i64: 128, 384>}, {pipeline_mode = #tpu.pipeline_mode<synchronous>, transform_indices = @transform_7, window_bounds = array<i64: 8, 256>}, {transform_indices = @transform_8, window_bounds = array<i64: 64, 128>}]} {
    %c0 = arith.constant 0 : index
    %c0_0 = arith.constant 0 : index
    %0 = vector.load %arg3[%c0, %c0_0] : memref<64x128xf32, #tpu.memory_space<vmem>>, vector<64x128xf32>
    %1 = arith.mulf %0, %0 : vector<64x128xf32>
    %cst = arith.constant dense<0.000000e+00> : vector<64xf32>
    %2 = vector.multi_reduction <add>, %1, %cst [1] : vector<64x128xf32> to vector<64xf32>
    %3 = vector.shape_cast %2 : vector<64xf32> to vector<64x1xf32>
    %cst_1 = arith.constant 9.99999996E-13 : f32
    %4 = vector.broadcast %cst_1 : f32 to vector<64x1xf32>
    %5 = arith.addf %3, %4 : vector<64x1xf32>
    %6 = math.rsqrt %5 : vector<64x1xf32>
    %7 = vector.broadcast %6 : vector<64x1xf32> to vector<64x128xf32>
    %8 = arith.mulf %0, %7 : vector<64x128xf32>
    %c0_2 = arith.constant 0 : index
    %c0_3 = arith.constant 0 : index
    %9 = vector.load %arg8[%c0_2, %c0_3] : memref<8x256xf32, #tpu.memory_space<vmem>>, vector<1x256xf32>
    %c1 = arith.constant 1 : index
    %c0_4 = arith.constant 0 : index
    %10 = vector.load %arg8[%c1, %c0_4] : memref<8x256xf32, #tpu.memory_space<vmem>>, vector<1x128xf32>
    %c2 = arith.constant 2 : index
    %c0_5 = arith.constant 0 : index
    %11 = vector.load %arg8[%c2, %c0_5] : memref<8x256xf32, #tpu.memory_space<vmem>>, vector<1x128xf32>
    %c3 = arith.constant 3 : index
    %c0_6 = arith.constant 0 : index
    %12 = vector.load %arg8[%c3, %c0_6] : memref<8x256xf32, #tpu.memory_space<vmem>>, vector<1x128xf32>
    %c4 = arith.constant 4 : index
    %c0_7 = arith.constant 0 : index
    %13 = vector.load %arg8[%c4, %c0_7] : memref<8x256xf32, #tpu.memory_space<vmem>>, vector<1x128xf32>
    %14 = arith.truncf %8 : vector<64x128xf32> to vector<64x128xbf16>
    %c0_8 = arith.constant 0 : index
    %c0_9 = arith.constant 0 : index
    %15 = vector.load %arg4[%c0_8, %c0_9] : memref<128x256xbf16, #tpu.memory_space<vmem>>, vector<128x256xbf16>
    %cst_10 = arith.constant dense<0.000000e+00> : vector<64x256xf32>
    %16 = tpu.matmul %14, %15, %cst_10 {dimension_numbers = #tpu.dot_dimension_numbers<[1], [0], [0], [1], [0, 0, 1, 1], [], []>} : vector<64x128xbf16>, vector<128x256xbf16>, vector<64x256xf32> -> vector<64x256xf32>
    %17 = vector.broadcast %9 : vector<1x256xf32> to vector<64x256xf32>
    %18 = arith.addf %16, %17 : vector<64x256xf32>
    %19 = vector.extract_strided_slice %18 {offsets = [0, 0], sizes = [64, 128], strides = [1, 1]} : vector<64x256xf32> to vector<64x128xf32>
    %20 = arith.truncf %19 : vector<64x128xf32> to vector<64x128xbf16>
    %21 = vector.extract_strided_slice %18 {offsets = [0, 128], sizes = [64, 128], strides = [1, 1]} : vector<64x256xf32> to vector<64x128xf32>
    %22 = arith.truncf %21 : vector<64x128xf32> to vector<64x128xbf16>
    %c0_11 = arith.constant 0 : index
    %c0_12 = arith.constant 0 : index
    %c0_13 = arith.constant 0 : index
    %23 = vector.load %arg1[%c0_11, %c0_12, %c0_13] : memref<1x64x64xbf16, #tpu.memory_space<vmem>>, vector<1x64x64xbf16>
    %24 = vector.shape_cast %23 : vector<1x64x64xbf16> to vector<64x64xbf16>
    %cst_14 = arith.constant dense<0.000000e+00> : vector<64x128xf32>
    %25 = tpu.matmul %24, %20, %cst_14 {dimension_numbers = #tpu.dot_dimension_numbers<[1], [0], [0], [1], [0, 0, 1, 1], [], []>} : vector<64x64xbf16>, vector<64x128xbf16>, vector<64x128xf32> -> vector<64x128xf32>
    %26 = arith.truncf %25 : vector<64x128xf32> to vector<64x128xbf16>
    %c0_15 = arith.constant 0 : index
    %c0_16 = arith.constant 0 : index
    %c0_17 = arith.constant 0 : index
    %27 = vector.load %arg2[%c0_15, %c0_16, %c0_17] : memref<1x64x64xbf16, #tpu.memory_space<vmem>>, vector<1x64x64xbf16>
    %28 = vector.shape_cast %27 : vector<1x64x64xbf16> to vector<64x64xbf16>
    %cst_18 = arith.constant dense<0.000000e+00> : vector<64x128xf32>
    %29 = tpu.matmul %28, %22, %cst_18 {dimension_numbers = #tpu.dot_dimension_numbers<[1], [0], [0], [1], [0, 0, 1, 1], [], []>} : vector<64x64xbf16>, vector<64x128xbf16>, vector<64x128xf32> -> vector<64x128xf32>
    %30 = arith.truncf %29 : vector<64x128xf32> to vector<64x128xbf16>
    %c0_19 = arith.constant 0 : index
    %c0_20 = arith.constant 0 : index
    %31 = vector.load %arg5[%c0_19, %c0_20] : memref<128x384xbf16, #tpu.memory_space<vmem>>, vector<128x128xbf16>
    %cst_21 = arith.constant dense<0.000000e+00> : vector<64x128xf32>
    %32 = tpu.matmul %26, %31, %cst_21 {dimension_numbers = #tpu.dot_dimension_numbers<[1], [0], [0], [1], [0, 0, 1, 1], [], []>} : vector<64x128xbf16>, vector<128x128xbf16>, vector<64x128xf32> -> vector<64x128xf32>
    %c0_22 = arith.constant 0 : index
    %c0_23 = arith.constant 0 : index
    %33 = vector.load %arg6[%c0_22, %c0_23] : memref<128x384xbf16, #tpu.memory_space<vmem>>, vector<128x128xbf16>
    %cst_24 = arith.constant dense<0.000000e+00> : vector<64x128xf32>
    %34 = tpu.matmul %30, %33, %cst_24 {dimension_numbers = #tpu.dot_dimension_numbers<[1], [0], [0], [1], [0, 0, 1, 1], [], []>} : vector<64x128xbf16>, vector<128x128xbf16>, vector<64x128xf32> -> vector<64x128xf32>
    %35 = arith.addf %32, %34 : vector<64x128xf32>
    %c0_25 = arith.constant 0 : index
    %c0_26 = arith.constant 0 : index
    %36 = vector.load %arg7[%c0_25, %c0_26] : memref<128x384xbf16, #tpu.memory_space<vmem>>, vector<128x128xbf16>
    %cst_27 = arith.constant dense<0.000000e+00> : vector<64x128xf32>
    %37 = tpu.matmul %14, %36, %cst_27 {dimension_numbers = #tpu.dot_dimension_numbers<[1], [0], [0], [1], [0, 0, 1, 1], [], []>} : vector<64x128xbf16>, vector<128x128xbf16>, vector<64x128xf32> -> vector<64x128xf32>
    %38 = arith.addf %35, %37 : vector<64x128xf32>
    %39 = vector.broadcast %10 : vector<1x128xf32> to vector<64x128xf32>
    %40 = arith.addf %38, %39 : vector<64x128xf32>
    %41 = arith.negf %40 : vector<64x128xf32>
    %42 = math.exp %41 : vector<64x128xf32>
    %cst_28 = arith.constant 1.000000e+00 : f32
    %43 = vector.broadcast %cst_28 : f32 to vector<64x128xf32>
    %44 = arith.addf %43, %42 : vector<64x128xf32>
    %45 = arith.divf %43, %44 : vector<64x128xf32>
    %c0_29 = arith.constant 0 : index
    %c128 = arith.constant 128 : index
    %46 = vector.load %arg5[%c0_29, %c128] : memref<128x384xbf16, #tpu.memory_space<vmem>>, vector<128x128xbf16>
    %cst_30 = arith.constant dense<0.000000e+00> : vector<64x128xf32>
    %47 = tpu.matmul %26, %46, %cst_30 {dimension_numbers = #tpu.dot_dimension_numbers<[1], [0], [0], [1], [0, 0, 1, 1], [], []>} : vector<64x128xbf16>, vector<128x128xbf16>, vector<64x128xf32> -> vector<64x128xf32>
    %c0_31 = arith.constant 0 : index
    %c128_32 = arith.constant 128 : index
    %48 = vector.load %arg6[%c0_31, %c128_32] : memref<128x384xbf16, #tpu.memory_space<vmem>>, vector<128x128xbf16>
    %cst_33 = arith.constant dense<0.000000e+00> : vector<64x128xf32>
    %49 = tpu.matmul %30, %48, %cst_33 {dimension_numbers = #tpu.dot_dimension_numbers<[1], [0], [0], [1], [0, 0, 1, 1], [], []>} : vector<64x128xbf16>, vector<128x128xbf16>, vector<64x128xf32> -> vector<64x128xf32>
    %50 = arith.addf %47, %49 : vector<64x128xf32>
    %c0_34 = arith.constant 0 : index
    %c128_35 = arith.constant 128 : index
    %51 = vector.load %arg7[%c0_34, %c128_35] : memref<128x384xbf16, #tpu.memory_space<vmem>>, vector<128x128xbf16>
    %cst_36 = arith.constant dense<0.000000e+00> : vector<64x128xf32>
    %52 = tpu.matmul %14, %51, %cst_36 {dimension_numbers = #tpu.dot_dimension_numbers<[1], [0], [0], [1], [0, 0, 1, 1], [], []>} : vector<64x128xbf16>, vector<128x128xbf16>, vector<64x128xf32> -> vector<64x128xf32>
    %53 = arith.addf %50, %52 : vector<64x128xf32>
    %54 = vector.broadcast %11 : vector<1x128xf32> to vector<64x128xf32>
    %55 = arith.addf %53, %54 : vector<64x128xf32>
    %56 = arith.negf %55 : vector<64x128xf32>
    %57 = math.exp %56 : vector<64x128xf32>
    %cst_37 = arith.constant 1.000000e+00 : f32
    %58 = vector.broadcast %cst_37 : f32 to vector<64x128xf32>
    %59 = arith.addf %58, %57 : vector<64x128xf32>
    %60 = arith.divf %58, %59 : vector<64x128xf32>
    %c0_38 = arith.constant 0 : index
    %c256 = arith.constant 256 : index
    %61 = vector.load %arg5[%c0_38, %c256] : memref<128x384xbf16, #tpu.memory_space<vmem>>, vector<128x128xbf16>
    %cst_39 = arith.constant dense<0.000000e+00> : vector<64x128xf32>
    %62 = tpu.matmul %26, %61, %cst_39 {dimension_numbers = #tpu.dot_dimension_numbers<[1], [0], [0], [1], [0, 0, 1, 1], [], []>} : vector<64x128xbf16>, vector<128x128xbf16>, vector<64x128xf32> -> vector<64x128xf32>
    %c0_40 = arith.constant 0 : index
    %c256_41 = arith.constant 256 : index
    %63 = vector.load %arg6[%c0_40, %c256_41] : memref<128x384xbf16, #tpu.memory_space<vmem>>, vector<128x128xbf16>
    %cst_42 = arith.constant dense<0.000000e+00> : vector<64x128xf32>
    %64 = tpu.matmul %30, %63, %cst_42 {dimension_numbers = #tpu.dot_dimension_numbers<[1], [0], [0], [1], [0, 0, 1, 1], [], []>} : vector<64x128xbf16>, vector<128x128xbf16>, vector<64x128xf32> -> vector<64x128xf32>
    %65 = arith.addf %62, %64 : vector<64x128xf32>
    %66 = vector.broadcast %12 : vector<1x128xf32> to vector<64x128xf32>
    %67 = arith.addf %65, %66 : vector<64x128xf32>
    %c0_43 = arith.constant 0 : index
    %c256_44 = arith.constant 256 : index
    %68 = vector.load %arg7[%c0_43, %c256_44] : memref<128x384xbf16, #tpu.memory_space<vmem>>, vector<128x128xbf16>
    %cst_45 = arith.constant dense<0.000000e+00> : vector<64x128xf32>
    %69 = tpu.matmul %14, %68, %cst_45 {dimension_numbers = #tpu.dot_dimension_numbers<[1], [0], [0], [1], [0, 0, 1, 1], [], []>} : vector<64x128xbf16>, vector<128x128xbf16>, vector<64x128xf32> -> vector<64x128xf32>
    %70 = vector.broadcast %13 : vector<1x128xf32> to vector<64x128xf32>
    %71 = arith.addf %69, %70 : vector<64x128xf32>
    %72 = arith.mulf %45, %71 : vector<64x128xf32>
    %73 = arith.addf %67, %72 : vector<64x128xf32>
    %74 = math.tanh %73 : vector<64x128xf32>
    %75 = arith.subf %8, %74 : vector<64x128xf32>
    %76 = arith.mulf %60, %75 : vector<64x128xf32>
    %77 = arith.addf %74, %76 : vector<64x128xf32>
    %c0_46 = arith.constant 0 : index
    %c0_47 = arith.constant 0 : index
    %78 = vector.load %arg9[%c0_46, %c0_47] : memref<64x128xf32, #tpu.memory_space<vmem>>, vector<64x128xf32>
    tpu.vector_store %arg9[%c0_46, %c0_47], %77 {strides = array<i32>} : memref<64x128xf32, #tpu.memory_space<vmem>>, vector<64x128xf32>,
    return
  }
  func.func @transform_0(%arg0: i32) -> (i32, i32, i32) {
    %c0_i32 = arith.constant 0 : i32
    %c0_i32_0 = arith.constant 0 : i32
    %c0_i32_1 = arith.constant 0 : i32
    return %arg0, %c0_i32, %c0_i32_0 : i32, i32, i32
  }
  func.func @transform_1(%arg0: i32) -> (i32, i32, i32) {
    %c0_i32 = arith.constant 0 : i32
    %c0_i32_0 = arith.constant 0 : i32
    %c0_i32_1 = arith.constant 0 : i32
    return %arg0, %c0_i32, %c0_i32_0 : i32, i32, i32
  }
  func.func @transform_2(%arg0: i32) -> (i32, i32) {
    %c0_i32 = arith.constant 0 : i32
    %c0_i32_0 = arith.constant 0 : i32
    return %arg0, %c0_i32 : i32, i32
  }
  func.func @transform_3(%arg0: i32) -> (i32, i32) {
    %c0_i32 = arith.constant 0 : i32
    %c0_i32_0 = arith.constant 0 : i32
    %c0_i32_1 = arith.constant 0 : i32
    return %c0_i32, %c0_i32_0 : i32, i32
  }
  func.func @transform_4(%arg0: i32) -> (i32, i32) {
    %c0_i32 = arith.constant 0 : i32
    %c0_i32_0 = arith.constant 0 : i32
    %c0_i32_1 = arith.constant 0 : i32
    return %c0_i32, %c0_i32_0 : i32, i32
  }
  func.func @transform_5(%arg0: i32) -> (i32, i32) {
    %c0_i32 = arith.constant 0 : i32
    %c0_i32_0 = arith.constant 0 : i32
    %c0_i32_1 = arith.constant 0 : i32
    return %c0_i32, %c0_i32_0 : i32, i32
  }
  func.func @transform_6(%arg0: i32) -> (i32, i32) {
    %c0_i32 = arith.constant 0 : i32
    %c0_i32_0 = arith.constant 0 : i32
    %c0_i32_1 = arith.constant 0 : i32
    return %c0_i32, %c0_i32_0 : i32, i32
  }
  func.func @transform_7(%arg0: i32) -> (i32, i32) {
    %c0_i32 = arith.constant 0 : i32
    %c0_i32_0 = arith.constant 0 : i32
    %c0_i32_1 = arith.constant 0 : i32
    return %c0_i32, %c0_i32_0 : i32, i32
  }
  func.func @transform_8(%arg0: i32) -> (i32, i32) {
    %c0_i32 = arith.constant 0 : i32
    %c0_i32_0 = arith.constant 0 : i32
    return %arg0, %c0_i32 : i32, i32
  }
}

</mosaic_0001>

<bundles_post_ra>
// kernel: tpu_custom_call.1
= control target key start
LH: loop header
LB: loop body
LE: loop exit
PB: predicated region body
PF: predicated region fallthrough
CT: control target
= control target key end

     0   :  { %13 = vsyncpa [#allocation3], 0  ;;  %s3305_s0 = inlined_call_operand.hbm [shape: bf16[1,64,64], index: 0, kind: input, shape index: {}]   ;;  %s3306_s1 = inlined_call_operand.hbm [shape: bf16[1,64,64], index: 1, kind: input, shape index: {}]   ;;  %s3307_s2 = inlined_call_operand.hbm [shape: f32[64,128], index: 2, kind: input, shape index: {}]   ;;  %s3308_s3 = inlined_call_operand.hbm [shape: bf16[128,256], index: 3, kind: input, shape index: {}]   ;;  %s3309_s4 = inlined_call_operand.hbm [shape: bf16[128,384], index: 4, kind: input, shape index: {}]   ;;  %s3310_s5 = inlined_call_operand.hbm [shape: bf16[128,384], index: 5, kind: input, shape index: {}]   ;;  %s3311_s6 = inlined_call_operand.hbm [shape: bf16[128,384], index: 6, kind: input, shape index: {}]   ;;  %s3312_s7 = inlined_call_operand.vmem [shape: f32[8,256], index: 7, kind: input, shape index: {}]   ;;  %s3313_s8 = inlined_call_operand.hbm [shape: f32[64,128], index: 8, kind: output, shape index: {}]  }
   0x1   :  { %14 = vsyncpa [#allocation6], 0 }
   0x2   :  { %15 = vsyncpa [#allocation9], 0 }
   0x3   :  { %16 = vsyncpa [#allocation12], 0 }
   0x4   :  { %17 = vsyncpa [#allocation4], 0  ;;  %s2904_s27 = smov [#allocation5]   ;;  %s2718_s9 = scalar_lea.hbm %s3306_s1, 512 }
   0x5   :  { %s35_s28 = sshll.u32 %s2904_s27, 4  ;;  %p2719_p0 = scmp.ne.s32.totalorder %s3306_s1, %s2718_s9  ;;  %s36_s28 = int_to_ptr.vmem [resolvable:$true] %s35_s28 }
   0x6   :  { %p2722_p1 = scmp.lt.u32.totalorder %s2718_s9, %s3306_s1 }
   0x8   :  { %p2724_p2 = pnand %p2722_p1, %p2719_p0 }
   0xa   :  { %2727 = shalt.err (!%p2724_p2)
}
   0xb   :  { %s2728_s14 = scalar_lea.vmem %s36_s28, 512  ;;  %p2733_p4 = scmp.lt.s32.totalorder %s36_s28, %s36_s28 }
   0xc   :  { %p2729_p3 = scmp.ne.s32.totalorder %s36_s28, %s2728_s14  ;;  %p2734_p5 = scmp.lt.s32.totalorder %s2728_s14, %s2728_s14 }
   0xe   :  { %p2735_p6 = por %p2734_p5, %p2733_p4 }
  0x10   :  { %p2736_p7 = pnand %p2735_p6, %p2729_p3 }
  0x12   :  { %2739 = shalt.err (!%p2736_p7)
}
  0x13   :  { %s2905_s15 = smov 64   ;;  %s2906_s16 = smov 4  }
  0x14   :  { %41 = dma.hbm_to_vmem [thread:$0]  %s3306_s1, 512, %s36_s28, [#allocation6], %s2905_s15, %s2905_s15, %s2906_s16  }
  0x15   :  { %s2907_s19 = smov [#allocation8]   ;;  %s2740_s23 = scalar_lea.hbm %s3308_s3, 2048 }
  0x16   :  { %s59_s20 = sshll.u32 %s2907_s19, 4  ;;  %p2741_p8 = scmp.ne.s32.totalorder %s3308_s3, %s2740_s23  ;;  %s60_s20 = int_to_ptr.vmem [resolvable:$true] %s59_s20 }
  0x17   :  { %p2744_p9 = scmp.lt.u32.totalorder %s2740_s23, %s3308_s3 }
  0x19   :  { %p2746_p10 = pnand %p2744_p9, %p2741_p8 }
  0x1b   :  { %2749 = shalt.err (!%p2746_p10)
}
  0x1c   :  { %s2750_s29 = scalar_lea.vmem %s60_s20, 2048  ;;  %p2755_p12 = scmp.lt.s32.totalorder %s60_s20, %s60_s20 }
  0x1d   :  { %p2751_p11 = scmp.ne.s32.totalorder %s60_s20, %s2750_s29  ;;  %p2756_p13 = scmp.lt.s32.totalorder %s2750_s29, %s2750_s29 }
  0x1f   :  { %p2757_p0 = por %p2756_p13, %p2755_p12 }
  0x21   :  { %p2758_p1 = pnand %p2757_p0, %p2751_p11 }
  0x23   :  { %2761 = shalt.err (!%p2758_p1)
}
  0x24   :  { %s2908_s1 = smov 128   ;;  %s2909_s28 = smov 8  }
  0x25   :  { %65 = dma.hbm_to_vmem [thread:$0]  %s3308_s3, 2048, %s60_s20, [#allocation9], %s2908_s1, %s2908_s1, %s2909_s28  }
  0x26   :  { %s2910_s10 = smov [#allocation11]   ;;  %s2911_s12 = smov [#allocation2]  }
  0x27   :  { %s83_s11 = sshll.u32 %s2910_s10, 4  ;;  %s23_s13 = sshll.u32 %s2911_s12, 4  ;;  %s84_s11 = int_to_ptr.vmem [resolvable:$true] %s83_s11  ;;  %s2994_s13 = int_to_ptr.vmem [resolvable:$true] %s23_s13 }
  0x28   :  { %s2762_s18 = scalar_lea.hbm %s3310_s5, 3072 }
  0x29   :  { %p2763_p2 = scmp.ne.s32.totalorder %s3310_s5, %s2762_s18  ;;  %p2766_p3 = scmp.lt.u32.totalorder %s2762_s18, %s3310_s5 }
  0x2b   :  { %p2768_p4 = pnand %p2766_p3, %p2763_p2 }
  0x2d   :  { %2771 = shalt.err (!%p2768_p4)
}
  0x2e   :  { %s2772_s3 = scalar_lea.vmem %s84_s11, 3072  ;;  %p2777_p6 = scmp.lt.s32.totalorder %s84_s11, %s84_s11 }
  0x2f   :  { %p2773_p5 = scmp.ne.s32.totalorder %s84_s11, %s2772_s3  ;;  %p2778_p7 = scmp.lt.s32.totalorder %s2772_s3, %s2772_s3 }
  0x31   :  { %p2779_p8 = por %p2778_p7, %p2777_p6 }
  0x33   :  { %p2780_p9 = pnand %p2779_p8, %p2773_p5 }
  0x35   :  { %2783 = shalt.err (!%p2780_p9)
}
  0x36   :  { %s2912_s20 = smov 192   ;;  %s2913_s24 = smov 12  }
  0x37   :  { %89 = dma.hbm_to_vmem [thread:$0]  %s3310_s5, 3072, %s84_s11, [#allocation12], %s2912_s20, %s2912_s20, %s2913_s24  }
  0x38   :  { %s2784_s30 = scalar_lea.hbm %s3305_s0, 512 }
  0x39   :  { %p2785_p10 = scmp.ne.s32.totalorder %s3305_s0, %s2784_s30  ;;  %p2788_p11 = scmp.lt.u32.totalorder %s2784_s30, %s3305_s0 }
  0x3b   :  { %p2790_p12 = pnand %p2788_p11, %p2785_p10 }
  0x3d   :  { %2793 = shalt.err (!%p2790_p12)
}
  0x3e   :  { %s2794_s17 = scalar_lea.vmem %s2994_s13, 512  ;;  %p2799_p0 = scmp.lt.s32.totalorder %s2994_s13, %s2994_s13 }
  0x3f   :  { %p2795_p13 = scmp.ne.s32.totalorder %s2994_s13, %s2794_s17  ;;  %p2800_p1 = scmp.lt.s32.totalorder %s2794_s17, %s2794_s17 }
  0x41   :  { %p2801_p2 = por %p2800_p1, %p2799_p0 }
  0x43   :  { %p2802_p3 = pnand %p2801_p2, %p2795_p13 }
  0x45   :  { %2805 = shalt.err (!%p2802_p3)
}
  0x46   :  { %29 = dma.hbm_to_vmem [thread:$0]  %s3305_s0, 512, %s2994_s13, [#allocation3], %s2905_s15, %s2905_s15, %s2906_s16  }
  0x47   :  { %s2914_s18 = smov [#allocation7]   ;;  %s2915_s21 = smov [#allocation10]  }
  0x48   :  { %s47_s19 = sshll.u32 %s2914_s18, 4  ;;  %s71_s22 = sshll.u32 %s2915_s21, 4  ;;  %s48_s19 = int_to_ptr.vmem [resolvable:$true] %s47_s19  ;;  %s3031_s22 = int_to_ptr.vmem [resolvable:$true] %s71_s22 }
  0x49   :  { %s2806_s25 = scalar_lea.hbm %s3307_s2, 1024 }
  0x4a   :  { %p2807_p4 = scmp.ne.s32.totalorder %s3307_s2, %s2806_s25  ;;  %p2810_p5 = scmp.lt.u32.totalorder %s2806_s25, %s3307_s2 }
  0x4c   :  { %p2812_p6 = pnand %p2810_p5, %p2807_p4 }
  0x4e   :  { %2815 = shalt.err (!%p2812_p6)
}
  0x4f   :  { %s2816_s0 = scalar_lea.vmem %s48_s19, 1024  ;;  %p2821_p8 = scmp.lt.s32.totalorder %s48_s19, %s48_s19 }
  0x50   :  { %p2817_p7 = scmp.ne.s32.totalorder %s48_s19, %s2816_s0  ;;  %p2822_p9 = scmp.lt.s32.totalorder %s2816_s0, %s2816_s0 }
  0x52   :  { %p2823_p10 = por %p2822_p9, %p2821_p8 }
  0x54   :  { %p2824_p11 = pnand %p2823_p10, %p2817_p7 }
  0x56   :  { %2827 = shalt.err (!%p2824_p11)
}
  0x57   :  { %53 = dma.hbm_to_vmem [thread:$0]  %s3307_s2, 1024, %s48_s19, [#allocation6], %s2908_s1, %s2908_s1, %s2909_s28  }
  0x58   :  { %s2828_s10 = scalar_lea.hbm %s3309_s4, 3072 }
  0x59   :  { %p2829_p12 = scmp.ne.s32.totalorder %s3309_s4, %s2828_s10  ;;  %p2832_p13 = scmp.lt.u32.totalorder %s2828_s10, %s3309_s4 }
  0x5b   :  { %p2834_p0 = pnand %p2832_p13, %p2829_p12 }
  0x5d   :  { %2837 = shalt.err (!%p2834_p0)
}
  0x5e   :  { %s2838_s11 = scalar_lea.vmem %s3031_s22, 3072  ;;  %p2843_p2 = scmp.lt.s32.totalorder %s3031_s22, %s3031_s22 }
  0x5f   :  { %p2839_p1 = scmp.ne.s32.totalorder %s3031_s22, %s2838_s11  ;;  %p2844_p3 = scmp.lt.s32.totalorder %s2838_s11, %s2838_s11 }
  0x61   :  { %p2845_p4 = por %p2844_p3, %p2843_p2 }
  0x63   :  { %p2846_p5 = pnand %p2845_p4, %p2839_p1 }
  0x65   :  { %2849 = shalt.err (!%p2846_p5)
}
  0x66   :  { %77 = dma.hbm_to_vmem [thread:$0]  %s3309_s4, 3072, %s3031_s22, [#allocation9], %s2912_s20, %s2912_s20, %s2913_s24  }
  0x67   :  { %s2916_s19 = smov [#allocation13]   ;;  %s2850_s25 = scalar_lea.hbm %s3311_s6, 3072 }
  0x68   :  { %s95_s21 = sshll.u32 %s2916_s19, 4  ;;  %p2851_p6 = scmp.ne.s32.totalorder %s3311_s6, %s2850_s25  ;;  %s96_s21 = int_to_ptr.vmem [resolvable:$true] %s95_s21 }
  0x69   :  { %p2854_p7 = scmp.lt.u32.totalorder %s2850_s25, %s3311_s6 }
  0x6b   :  { %p2856_p8 = pnand %p2854_p7, %p2851_p6 }
  0x6d   :  { %2859 = shalt.err (!%p2856_p8)
}
  0x6e   :  { %s2860_s0 = scalar_lea.vmem %s96_s21, 3072  ;;  %p2865_p10 = scmp.lt.s32.totalorder %s96_s21, %s96_s21 }
  0x6f   :  { %p2861_p9 = scmp.ne.s32.totalorder %s96_s21, %s2860_s0  ;;  %p2866_p11 = scmp.lt.s32.totalorder %s2860_s0, %s2860_s0 }
  0x71   :  { %p2867_p12 = por %p2866_p11, %p2865_p10 }
  0x73   :  { %p2868_p13 = pnand %p2867_p12, %p2861_p9 }
  0x75   :  { %2871 = shalt.err (!%p2868_p13)
}
  0x76   :  { %101 = dma.hbm_to_vmem [thread:$0]  %s3311_s6, 3072, %s96_s21, [#allocation12], %s2912_s20, %s2912_s20, %s2913_s24  }
  0x77   :  { %2894 = dma.done.wait [#allocation3], 512  }
  0x78   :  { %2895 = vsyncadd [#allocation3], 4294966784 }
  0x79   :  { %2896 = dma.done.wait [#allocation6], 1536  }
  0x7a   :  { %2897 = vsyncadd [#allocation6], 4294965760 }
  0x7b   :  { %2898 = dma.done.wait [#allocation9], 5120  }
  0x7c   :  { %2899 = vsyncadd [#allocation9], 4294962176 }
  0x7d   :  { %2900 = dma.done.wait [#allocation12], 6144  }
  0x7e   :  { %2901 = vsyncadd [#allocation12], 4294961152  ;;  %v3083_v0 = vld [vmem:[#allocation7] sm:$0xff]  ;;  %v3085_v1 = vld [vmem:[#allocation7 + $0x10] sm:$0xff]  ;;  %v2917_v32 = vmov 0   ;;  %vm407_vm0 = vcmask 523264  }
  0x7f   :  { %v3087_v2 = vld [vmem:[#allocation7 + $0x8] sm:$0xff]  ;;  %v134_v3 = vmul.f32 %v3083_v0, %v3083_v0  ;;  %v136_v4 = vmul.f32 %v3085_v1, %v3085_v1  ;;  %v3093_v5 = vld [vmem:[#allocation7 + $0x18] sm:$0xff]  ;;  %v3097_v7 = vld [vmem:[#allocation7 + $0x20] sm:$0xff]  ;;  %330 = vmatprep.mubr.bf16.mxu0 %v2917_v32 }
  0x80   :  { %v3095_v6 = vld [vmem:[#allocation7 + $0x28] sm:$0xff]  ;;  %v135_v8 = vmul.f32 %v3087_v2, %v3087_v2  ;;  %v137_v9 = vmul.f32 %v3093_v5, %v3093_v5  ;;  %v2521_v12 = vld [vmem:[#allocation8 + $0x14] ss:$8 sps:$4 sm:$0xff]   ;;  %v2523_v15 = vld [vmem:[#allocation8 + $0x10] ss:$8 sps:$4 sm:$0xff]   ;;  %v138_v18 = vmul.f32 %v3097_v7, %v3097_v7 }
  0x81   :  { %142 = vadd.xlane.f32.xlu0 %v134_v3  ;;  %146 = vadd.xlane.f32.xlu1 %v136_v4  ;;  %v2518_v10 = vld [vmem:[#allocation8 + $0x4] ss:$8 sps:$4 sm:$0xff]   ;;  %v2520_v11 = vld [vmem:[#allocation8] ss:$8 sps:$4 sm:$0xff]   ;;  %v3103_v13 = vld [vmem:[#allocation7 + $0x38] sm:$0xff]  ;;  %v139_v17 = vmul.f32 %v3095_v6, %v3095_v6 }
  0x82   :  { %298 = vmatprep.subr.bf16.mxu0 %v2518_v10  ;;  %v3105_v14 = vld [vmem:[#allocation7 + $0x30] sm:$0xff]  ;;  %v2524_v16 = vld [vmem:[#allocation8 + $0x24] ss:$8 sps:$4 sm:$0xff]   ;;  %v2526_v19 = vld [vmem:[#allocation8 + $0x20] ss:$8 sps:$4 sm:$0xff]   ;;  %v141_v20 = vmul.f32 %v3103_v13, %v3103_v13 }
  0x83   :  { %299 = vmatpush1.bf16.msra.mxu0 %v2520_v11  ;;  %v140_v21 = vmul.f32 %v3105_v14, %v3105_v14  ;;  %v2527_v22 = vld [vmem:[#allocation8 + $0x34] ss:$8 sps:$4 sm:$0xff]   ;;  %v2529_v23 = vld [vmem:[#allocation8 + $0x30] ss:$8 sps:$4 sm:$0xff]   ;;  %v2530_v24 = vld [vmem:[#allocation8 + $0x44] ss:$8 sps:$4 sm:$0xff]  }
  0x84   :  { %300 = vmatprep.subr.bf16.mxu0 %v2521_v12  ;;  %v2532_v25 = vld [vmem:[#allocation8 + $0x40] ss:$8 sps:$4 sm:$0xff]   ;;  %v2533_v26 = vld [vmem:[#allocation8 + $0x54] ss:$8 sps:$4 sm:$0xff]   ;;  %v2535_v27 = vld [vmem:[#allocation8 + $0x50] ss:$8 sps:$4 sm:$0xff]  }
  0x85   :  { %144 = vadd.xlane.f32.xlu0 %v135_v8  ;;  %148 = vadd.xlane.f32.xlu1 %v137_v9  ;;  %v2536_v28 = vld [vmem:[#allocation8 + $0x64] ss:$8 sps:$4 sm:$0xff]   ;;  %v2538_v29 = vld [vmem:[#allocation8 + $0x60] ss:$8 sps:$4 sm:$0xff]   ;;  %v2539_v30 = vld [vmem:[#allocation8 + $0x74] ss:$8 sps:$4 sm:$0xff]   ;;  %v208_v9 = vlaneseq }
  0x86   :  { %v2541_v31 = vld [vmem:[#allocation8 + $0x70] ss:$8 sps:$4 sm:$0xff]   ;;  %v182_v12 = vld [vmem:[%s3312_s7] ss:$8 sm:$0x3] }
  0x87   :  { %301 = vmatpush1.bf16.msra.mxu0 %v2523_v15  ;;  %v2554_v8 = vld [vmem:[#allocation11 + $0x30] ss:$12 sps:$4 sm:$0xff]   ;;  %v209_v10 = vshrl.u32 %v208_v9, 7  ;;  %v2547_v9 = vld [vmem:[#allocation5 + $0x8] sm:$0xff]  }
  0x88   :  { %302 = vmatprep.subr.bf16.mxu0 %v2524_v16 }
  0x89   :  { %152 = vadd.xlane.f32.xlu1 %v139_v17  ;;  %150 = vadd.xlane.f32.xlu0 %v138_v18  ;;  %v210_v11 = vsub.s32 0, %v209_v10 }
  0x8b   :  { %303 = vmatpush1.bf16.msra.mxu0 %v2526_v19 }
  0x8c   :  { %304 = vmatprep.subr.bf16.mxu0 %v2527_v22 }
  0x8d   :  { %156 = vadd.xlane.f32.xlu1 %v141_v20  ;;  %154 = vadd.xlane.f32.xlu0 %v140_v21 }
  0x8f   :  { %305 = vmatpush1.bf16.msra.mxu0 %v2529_v23 }
  0x90   :  { %306 = vmatprep.subr.bf16.mxu0 %v2530_v24 }
  0x93   :  { %307 = vmatpush1.bf16.msra.mxu0 %v2532_v25 }
  0x94   :  { %308 = vmatprep.subr.bf16.mxu0 %v2533_v26 }
  0x97   :  { %309 = vmatpush1.bf16.msra.mxu0 %v2535_v27 }
  0x98   :  { %310 = vmatprep.subr.bf16.mxu0 %v2536_v28 }
  0x9b   :  { %311 = vmatpush1.bf16.msra.mxu0 %v2538_v29 }
  0x9c   :  { %312 = vmatprep.subr.bf16.mxu0 %v2539_v30 }
  0x9f   :  { %313 = vmatpush1.bf16.msra.mxu0 %v2541_v31 }
 0x10e   :  { %v143_v33 = vpop.xlane.xlu0 %142  ;;  %v147_v34 = vpop.xlane.xlu1 %146 }
 0x10f   :  { %v158_v35 = vadd.f32 1e-12, %v143_v33  ;;  %v160_v39 = vadd.f32 1e-12, %v147_v34 }
 0x111   :  { %2622 = vrsqrt.f32 %v158_v35 }
 0x112   :  { %v145_v36 = vpop.xlane.xlu0 %144  ;;  %v149_v37 = vpop.xlane.xlu1 %148 }
 0x113   :  { %v159_v38 = vadd.f32 1e-12, %v145_v36  ;;  %v161_v40 = vadd.f32 1e-12, %v149_v37 }
 0x115   :  { %2624 = vrsqrt.f32 %v159_v38 }
 0x116   :  { %v153_v41 = vpop.xlane.xlu1 %152  ;;  %2626 = vrsqrt.f32 %v160_v39  ;;  %v151_v42 = vpop.xlane.xlu0 %150 }
 0x117   :  { %2628 = vrsqrt.f32 %v161_v40  ;;  %v163_v43 = vadd.f32 1e-12, %v153_v41  ;;  %v162_v44 = vadd.f32 1e-12, %v151_v42 }
 0x119   :  { %2630 = vrsqrt.f32 %v163_v43 }
 0x11a   :  { %2632 = vrsqrt.f32 %v162_v44  ;;  %v157_v47 = vpop.xlane.xlu1 %156  ;;  %v155_v50 = vpop.xlane.xlu0 %154 }
 0x11b   :  { %v2623_v45 = vpop.eup %2622  ;;  %v165_v53 = vadd.f32 1e-12, %v157_v47  ;;  %v164_v55 = vadd.f32 1e-12, %v155_v50 }
 0x11c   :  { %v3116_v48 = vmul.f32 %v2623_v45, %v3083_v0 }
 0x11d   :  { %2634 = vrsqrt.f32 %v165_v53 }
 0x11e   :  { %2636 = vrsqrt.f32 %v164_v55 }
 0x11f   :  { %v2625_v46 = vpop.eup %2624 }
 0x120   :  { %v3119_v49 = vmul.f32 %v2625_v46, %v3087_v2  ;;  %v2627_v51 = vpop.eup %2626 }
 0x121   :  { %v2629_v54 = vpop.eup %2628  ;;  %v3127_v56 = vmul.f32 %v2627_v51, %v3085_v1 }
 0x122   :  { %v3123_v52 = vpack.c.bf16 %v3119_v49, %v3116_v48  ;;  %v3130_v57 = vmul.f32 %v2629_v54, %v3093_v5  ;;  %v2542_v5 = vld [vmem:[#allocation2] sm:$0xff]  }
 0x123   :  { %v2631_v58 = vpop.eup %2630  ;;  %2223 = vmatprep.mubr.msk.bf16.mxu1 %vm407_vm0, %v2542_v5  ;;  %v2544_v5 = vld [vmem:[#allocation2 + $0x10] sm:$0xff]  }
 0x124   :  { %331 = vmatmul.mubr.bf16.vlgmr.msra.gmra.mrb[0].mxu0 %v3123_v52  ;;  %v2633_v59 = vpop.eup %2632  ;;  %v3134_v60 = vpack.c.bf16 %v3130_v57, %v3127_v56  ;;  %v3141_v62 = vmul.f32 %v2631_v58, %v3095_v6  ;;  %v2550_v6 = vld [vmem:[#allocation11] ss:$12 sps:$4 sm:$0xff]  }
 0x125   :  { %340 = vmatprep.mubr.bf16.mxu0 %v2917_v32  ;;  %v3138_v61 = vmul.f32 %v2633_v59, %v3097_v7  ;;  %v2552_v7 = vld [vmem:[#allocation11 + $0x18] ss:$12 sps:$4 sm:$0xff]   ;;  %2247 = vmatprep.subr.bf16.mxu0 %v2550_v6 }
 0x126   :  { %2248 = vmatpush3.bf16.msra.mxu0 %v2550_v6  ;;  %v2545_v6 = vld [vmem:[#allocation2 + $0x18] sm:$0xff]  }
 0x127   :  { %v2635_v63 = vpop.eup %2634  ;;  %v3145_v0 = vpack.c.bf16 %v3141_v62, %v3138_v61  ;;  %2249 = vmatprep.subr.bf16.mxu0 %v2552_v7 }
 0x128   :  { %v2637_v1 = vpop.eup %2636  ;;  %v3152_v3 = vmul.f32 %v2635_v63, %v3103_v13  ;;  %v214_v13 = vsub.s32 1, %v209_v10  ;;  %v2548_v10 = vld [vmem:[#allocation5 + $0x10] sm:$0xff]  }
 0x129   :  { %v3149_v2 = vmul.f32 %v2637_v1, %v3105_v14  ;;  %v211_v14 = vrot.slane %v182_v12, %v210_v11  ;;  %v2543_v1 = vld [vmem:[#allocation2 + $0x8] sm:$0xff]  }
 0x12a   :  { %2250 = vmatpush3.bf16.msra.mxu0 %v2552_v7  ;;  %v215_v16 = vrot.slane %v182_v12, %v214_v13  ;;  %v2546_v7 = vld [vmem:[#allocation5] sm:$0xff]   ;;  %v2553_v11 = vld [vmem:[#allocation11 + $0x1c] ss:$12 sps:$4 sm:$0xff]  }
 0x12b   :  { %v3156_v4 = vpack.c.bf16 %v3152_v3, %v3149_v2  ;;  %2251 = vmatprep.subr.bf16.mxu0 %v2554_v8  ;;  %v2555_v12 = vld [vmem:[#allocation11 + $0x34] ss:$12 sps:$4 sm:$0xff]   ;;  %v2549_v13 = vld [vmem:[#allocation5 + $0x18] sm:$0xff]  }
 0x12c   :  { %341 = vmatmul.mubr.bf16.gmra.mrb[4].mxu0 %v3134_v60 }
 0x12d   :  { %350 = vmatprep.mubr.bf16.mxu0 %v2917_v32 }
 0x12e   :  { %2252 = vmatpush3.bf16.msra.mxu0 %v2554_v8  ;;  %v2551_v8 = vld [vmem:[#allocation11 + $0x4] ss:$12 sps:$4 sm:$0xff]  }
 0x134   :  { %351 = vmatmul.mubr.bf16.gmra.mrb[8].mxu0 %v3145_v0 }
 0x135   :  { %360 = vmatprep.mubr.bf16.mxu0 %v2917_v32 }
 0x13c   :  { %361 = vmatmul.mubr.bf16.gmra.mrb[12].mxu0 %v3156_v4 }
 0x1f7   :  { %v332_v15 = vpop.f32.mrb[0].mxu0 }
 0x1f8   :  { %v334_v17 = vpop.f32.mrb[1].mxu0  ;;  %v333_v19 = vadd.f32 %v332_v15, %v211_v14  ;;  %v2557_v15 = vld [vmem:[#allocation11 + $0x4c] ss:$12 sps:$4 sm:$0xff]  }
 0x1f9   :  { %v336_v18 = vpop.f32.mrb[2].mxu0  ;;  %v335_v22 = vadd.f32 %v334_v17, %v215_v16  ;;  %v2559_v17 = vld [vmem:[#allocation11 + $0x64] ss:$12 sps:$4 sm:$0xff]  }
 0x1fa   :  { %v337_v20 = vadd.f32 %v336_v18, %v211_v14  ;;  %v338_v21 = vpop.f32.mrb[3].mxu0  ;;  %v2560_v18 = vld [vmem:[#allocation11 + $0x78] ss:$12 sps:$4 sm:$0xff]  }
 0x1fb   :  { %v339_v23 = vadd.f32 %v338_v21, %v215_v16  ;;  %v2563_v21 = vld [vmem:[#allocation11 + $0x94] ss:$12 sps:$4 sm:$0xff]  }
 0x1fc   :  { %v371_v24 = vpack.c.bf16 %v337_v20, %v333_v19  ;;  %v2561_v19 = vld [vmem:[#allocation11 + $0x7c] ss:$12 sps:$4 sm:$0xff]  }
 0x1fd   :  { %v375_v25 = vpack.c.bf16 %v339_v23, %v335_v22  ;;  %v2562_v20 = vld [vmem:[#allocation11 + $0x90] ss:$12 sps:$4 sm:$0xff]   ;;  %v2564_v22 = vld [vmem:[#allocation11 + $0xa8] ss:$12 sps:$4 sm:$0xff]   ;;  %v2565_v23 = vld [vmem:[#allocation11 + $0xac] ss:$12 sps:$4 sm:$0xff]  }
 0x1fe   :  { %2215 = vmatprep.subr.bf16.mxu1 %v371_v24 }
 0x1ff   :  { %v342_v26 = vpop.f32.mrb[4].mxu0  ;;  %2216 = vmatpush3.bf16.msra.mxu1 %v371_v24  ;;  %v2566_v24 = vld [vmem:[#allocation10] ss:$12 sps:$4 sm:$0xff]  }
 0x200   :  { %v344_v27 = vpop.f32.mrb[5].mxu0  ;;  %v343_v29 = vadd.f32 %v342_v26, %v211_v14 }
 0x201   :  { %v346_v28 = vpop.f32.mrb[6].mxu0  ;;  %v345_v32 = vadd.f32 %v344_v27, %v215_v16 }
 0x202   :  { %v347_v30 = vadd.f32 %v346_v28, %v211_v14  ;;  %v348_v31 = vpop.f32.mrb[7].mxu0 }
 0x203   :  { %v349_v33 = vadd.f32 %v348_v31, %v215_v16 }
 0x204   :  { %v372_v34 = vpack.c.bf16 %v347_v30, %v343_v29 }
 0x205   :  { %v376_v35 = vpack.c.bf16 %v349_v33, %v345_v32 }
 0x206   :  { %2217 = vmatprep.subr.bf16.mxu1 %v372_v34 }
 0x207   :  { %v352_v36 = vpop.f32.mrb[8].mxu0  ;;  %2218 = vmatpush3.bf16.msra.mxu1 %v372_v34 }
 0x208   :  { %v354_v37 = vpop.f32.mrb[9].mxu0  ;;  %v353_v39 = vadd.f32 %v352_v36, %v211_v14 }
 0x209   :  { %v356_v38 = vpop.f32.mrb[10].mxu0  ;;  %v355_v42 = vadd.f32 %v354_v37, %v215_v16 }
 0x20a   :  { %v357_v40 = vadd.f32 %v356_v38, %v211_v14  ;;  %v358_v41 = vpop.f32.mrb[11].mxu0 }
 0x20b   :  { %v359_v43 = vadd.f32 %v358_v41, %v215_v16 }
 0x20c   :  { %v373_v44 = vpack.c.bf16 %v357_v40, %v353_v39 }
 0x20d   :  { %v377_v45 = vpack.c.bf16 %v359_v43, %v355_v42 }
 0x20e   :  { %2219 = vmatprep.subr.bf16.mxu1 %v373_v44 }
 0x20f   :  { %v362_v46 = vpop.f32.mrb[12].mxu0  ;;  %2220 = vmatpush3.bf16.msra.mxu1 %v373_v44  ;;  %v2568_v44 = vld [vmem:[#allocation10 + $0x18] ss:$12 sps:$4 sm:$0xff]  }
 0x210   :  { %v364_v47 = vpop.f32.mrb[13].mxu0  ;;  %v363_v51 = vadd.f32 %v362_v46, %v211_v14 }
 0x211   :  { %v366_v50 = vpop.f32.mrb[14].mxu0  ;;  %v365_v55 = vadd.f32 %v364_v47, %v215_v16 }
 0x212   :  { %v367_v53 = vadd.f32 %v366_v50, %v211_v14  ;;  %v368_v54 = vpop.f32.mrb[15].mxu0  ;;  %v2556_v14 = vld [vmem:[#allocation11 + $0x48] ss:$12 sps:$4 sm:$0xff]   ;;  %v2570_v50 = vld [vmem:[#allocation10 + $0x30] ss:$12 sps:$4 sm:$0xff]  }
 0x213   :  { %v369_v58 = vadd.f32 %v368_v54, %v215_v16  ;;  %2253 = vmatprep.subr.bf16.mxu0 %v2556_v14  ;;  %v2558_v16 = vld [vmem:[#allocation11 + $0x60] ss:$12 sps:$4 sm:$0xff]  }
 0x214   :  { %v374_v59 = vpack.c.bf16 %v367_v53, %v363_v51  ;;  %2254 = vmatpush3.bf16.msra.mxu0 %v2556_v14  ;;  %v2571_v51 = vld [vmem:[#allocation10 + $0x34] ss:$12 sps:$4 sm:$0xff]   ;;  %v2584_v14 = vld [vmem:[#allocation13 + $0x18] ss:$12 sps:$4 sm:$0xff]  }
 0x215   :  { %v378_v63 = vpack.c.bf16 %v369_v58, %v365_v55  ;;  %2255 = vmatprep.subr.bf16.mxu0 %v2558_v16 }
 0x216   :  { %2221 = vmatprep.subr.bf16.mxu1 %v374_v59 }
 0x217   :  { %2222 = vmatpush3.bf16.msra.mxu1 %v374_v59  ;;  %v2572_v59 = vld [vmem:[#allocation10 + $0x48] ss:$12 sps:$4 sm:$0xff]  }
 0x218   :  { %2231 = vmatprep.subr.bf16.mxu1 %v375_v25  ;;  %2256 = vmatpush3.bf16.msra.mxu0 %v2558_v16  ;;  %v2586_v16 = vld [vmem:[#allocation13 + $0x30] ss:$12 sps:$4 sm:$0xff]  }
 0x219   :  { %2257 = vmatprep.subr.bf16.mxu0 %v2560_v18 }
 0x21a   :  { %2224 = vmatmul.mubr.msk.bf16.vlgmr.msra.gmra.mrb[0].mxu1 %vm407_vm0, %v2543_v1  ;;  %v2574_v1 = vld [vmem:[#allocation10 + $0x60] ss:$12 sps:$4 sm:$0xff]  }
 0x21b   :  { %2232 = vmatpush3.bf16.msra.mxu1 %v375_v25  ;;  %2227 = vmatprep.mubr.msk.bf16.mxu1 %vm407_vm0, %v2544_v5  ;;  %v2567_v25 = vld [vmem:[#allocation10 + $0x4] ss:$12 sps:$4 sm:$0xff]  }
 0x21c   :  { %2233 = vmatprep.subr.bf16.mxu1 %v376_v35  ;;  %2258 = vmatpush3.bf16.msra.mxu0 %v2560_v18  ;;  %v2575_v5 = vld [vmem:[#allocation10 + $0x64] ss:$12 sps:$4 sm:$0xff]   ;;  %v2588_v18 = vld [vmem:[#allocation13 + $0x48] ss:$12 sps:$4 sm:$0xff]  }
 0x21d   :  { %2259 = vmatprep.subr.bf16.mxu0 %v2562_v20 }
 0x21f   :  { %2234 = vmatpush3.bf16.msra.mxu1 %v376_v35 }
 0x220   :  { %2235 = vmatprep.subr.bf16.mxu1 %v377_v45  ;;  %2260 = vmatpush3.bf16.msra.mxu0 %v2562_v20  ;;  %v2590_v20 = vld [vmem:[#allocation13 + $0x60] ss:$12 sps:$4 sm:$0xff]  }
 0x221   :  { %2261 = vmatprep.subr.bf16.mxu0 %v2564_v22 }
 0x222   :  { %2228 = vmatmul.mubr.msk.bf16.gmra.mrb[4].mxu1 %vm407_vm0, %v2545_v6  ;;  %v2576_v6 = vld [vmem:[#allocation10 + $0x78] ss:$12 sps:$4 sm:$0xff]  }
 0x223   :  { %2236 = vmatpush3.bf16.msra.mxu1 %v377_v45  ;;  %2239 = vmatprep.mubr.msk.bf16.mxu1 %vm407_vm0, %v2546_v7  ;;  %v2569_v45 = vld [vmem:[#allocation10 + $0x1c] ss:$12 sps:$4 sm:$0xff]  }
 0x224   :  { %2237 = vmatprep.subr.bf16.mxu1 %v378_v63  ;;  %2262 = vmatpush3.bf16.msra.mxu0 %v2564_v22  ;;  %v2577_v7 = vld [vmem:[#allocation10 + $0x7c] ss:$12 sps:$4 sm:$0xff]   ;;  %v2592_v22 = vld [vmem:[#allocation13 + $0x78] ss:$12 sps:$4 sm:$0xff]  }
 0x225   :  { %2271 = vmatprep.subr.bf16.mxu0 %v2566_v24 }
 0x227   :  { %2238 = vmatpush3.bf16.msra.mxu1 %v378_v63  ;;  %v2573_v63 = vld [vmem:[#allocation10 + $0x4c] ss:$12 sps:$4 sm:$0xff]  }
 0x228   :  { %2319 = vmatprep.subr.bf16.mxu1 %v2551_v8 }
 0x22a   :  { %2240 = vmatmul.mubr.msk.bf16.vlgmr.msra.gmra.mrb[8].mxu1 %vm407_vm0, %v2547_v9  ;;  %v2579_v9 = vld [vmem:[#allocation10 + $0x94] ss:$12 sps:$4 sm:$0xff]  }
 0x22b   :  { %2243 = vmatprep.mubr.msk.bf16.mxu1 %vm407_vm0, %v2548_v10  ;;  %2320 = vmatpush3.bf16.msra.mxu1 %v2551_v8  ;;  %v2578_v8 = vld [vmem:[#allocation10 + $0x90] ss:$12 sps:$4 sm:$0xff]   ;;  %v2580_v10 = vld [vmem:[#allocation10 + $0xa8] ss:$12 sps:$4 sm:$0xff]  }
 0x22c   :  { %2321 = vmatprep.subr.bf16.mxu1 %v2553_v11 }
 0x22f   :  { %2322 = vmatpush3.bf16.msra.mxu1 %v2553_v11  ;;  %v2581_v11 = vld [vmem:[#allocation10 + $0xac] ss:$12 sps:$4 sm:$0xff]  }
 0x230   :  { %2323 = vmatprep.subr.bf16.mxu1 %v2555_v12 }
 0x232   :  { %2244 = vmatmul.mubr.msk.bf16.gmra.mrb[12].mxu1 %vm407_vm0, %v2549_v13  ;;  %v2583_v13 = vld [vmem:[#allocation13 + $0x4] ss:$12 sps:$4 sm:$0xff]  }
 0x233   :  { %2324 = vmatpush3.bf16.msra.mxu1 %v2555_v12  ;;  %v2582_v12 = vld [vmem:[#allocation13] ss:$12 sps:$4 sm:$0xff]  }
 0x234   :  { %2325 = vmatprep.subr.bf16.mxu1 %v2557_v15 }
 0x237   :  { %2326 = vmatpush3.bf16.msra.mxu1 %v2557_v15  ;;  %v2585_v15 = vld [vmem:[#allocation13 + $0x1c] ss:$12 sps:$4 sm:$0xff]  }
 0x238   :  { %2327 = vmatprep.subr.bf16.mxu1 %v2559_v17 }
 0x23b   :  { %2328 = vmatpush3.bf16.msra.mxu1 %v2559_v17  ;;  %v2587_v17 = vld [vmem:[#allocation13 + $0x34] ss:$12 sps:$4 sm:$0xff]  }
 0x23c   :  { %2329 = vmatprep.subr.bf16.mxu1 %v2561_v19 }
 0x23f   :  { %2330 = vmatpush3.bf16.msra.mxu1 %v2561_v19  ;;  %v2589_v19 = vld [vmem:[#allocation13 + $0x4c] ss:$12 sps:$4 sm:$0xff]  }
 0x240   :  { %2331 = vmatprep.subr.bf16.mxu1 %v2563_v21 }
 0x243   :  { %2332 = vmatpush3.bf16.msra.mxu1 %v2563_v21  ;;  %v2591_v21 = vld [vmem:[#allocation13 + $0x64] ss:$12 sps:$4 sm:$0xff]  }
 0x244   :  { %2333 = vmatprep.subr.bf16.mxu1 %v2565_v23 }
 0x247   :  { %2334 = vmatpush3.bf16.msra.mxu1 %v2565_v23  ;;  %v2593_v23 = vld [vmem:[#allocation13 + $0x7c] ss:$12 sps:$4 sm:$0xff]  }
 0x248   :  { %2343 = vmatprep.subr.bf16.mxu1 %v2567_v25 }
 0x2ed   :  { %v2225_v26 = vpop.f32.mrb[0].mxu1 }
 0x2ee   :  { %v454_v27 = vpop.f32.mrb[1].mxu1 }
 0x2ef   :  { %v2226_v28 = vpop.f32.mrb[2].mxu1 }
 0x2f0   :  { %v3170_v29 = vpack.c.bf16 %v2226_v28, %v2225_v26  ;;  %v457_v30 = vpop.f32.mrb[3].mxu1  ;;  %v2596_v26 = vld [vmem:[#allocation13 + $0xa8] ss:$12 sps:$4 sm:$0xff]  }
 0x2f1   :  { %v3172_v31 = vpack.c.bf16 %v457_v30, %v454_v27  ;;  %v2597_v27 = vld [vmem:[#allocation13 + $0xac] ss:$12 sps:$4 sm:$0xff]   ;;  %v2598_v28 = vld [vmem:[#allocation11 + $0x8] ss:$12 sps:$4 sm:$0xff]  }
 0x2f2   :  { %v2599_v30 = vld [vmem:[#allocation13 + $0x8] ss:$12 sps:$4 sm:$0xff]  }
 0x2f5   :  { %v2229_v32 = vpop.f32.mrb[4].mxu1 }
 0x2f6   :  { %v470_v33 = vpop.f32.mrb[5].mxu1 }
 0x2f7   :  { %v2230_v34 = vpop.f32.mrb[6].mxu1 }
 0x2f8   :  { %v3174_v35 = vpack.c.bf16 %v2230_v34, %v2229_v32  ;;  %v473_v36 = vpop.f32.mrb[7].mxu1  ;;  %v2600_v32 = vld [vmem:[#allocation11 + $0x20] ss:$12 sps:$4 sm:$0xff]   ;;  %v2602_v34 = vld [vmem:[#allocation11 + $0x38] ss:$12 sps:$4 sm:$0xff]  }
 0x2f9   :  { %v3176_v37 = vpack.c.bf16 %v473_v36, %v470_v33  ;;  %v2601_v33 = vld [vmem:[#allocation13 + $0x20] ss:$12 sps:$4 sm:$0xff]   ;;  %v2603_v36 = vld [vmem:[#allocation13 + $0x38] ss:$12 sps:$4 sm:$0xff]  }
 0x2fd   :  { %v2241_v38 = vpop.f32.mrb[8].mxu1 }
 0x2fe   :  { %v563_v39 = vpop.f32.mrb[9].mxu1 }
 0x2ff   :  { %v2242_v40 = vpop.f32.mrb[10].mxu1 }
 0x300   :  { %v3178_v41 = vpack.c.bf16 %v2242_v40, %v2241_v38  ;;  %v566_v42 = vpop.f32.mrb[11].mxu1  ;;  %v2604_v38 = vld [vmem:[#allocation11 + $0x50] ss:$12 sps:$4 sm:$0xff]   ;;  %v2606_v40 = vld [vmem:[#allocation11 + $0x68] ss:$12 sps:$4 sm:$0xff]  }
 0x301   :  { %v3180_v43 = vpack.c.bf16 %v566_v42, %v563_v39  ;;  %v2605_v39 = vld [vmem:[#allocation13 + $0x50] ss:$12 sps:$4 sm:$0xff]   ;;  %v2607_v42 = vld [vmem:[#allocation13 + $0x68] ss:$12 sps:$4 sm:$0xff]  }
 0x303   :  { %2263 = vmatprep.mubr.bf16.mxu0 %v3180_v43  ;;  %2335 = vmatprep.mubr.bf16.mxu1 %v3180_v43 }
 0x304   :  { %2264 = vmatmul.mubr.bf16.vlgmr.msra.gmra.mrb[16].mxu0 %v3178_v41  ;;  %2336 = vmatmul.mubr.bf16.vlgmr.msra.gmra.mrb[16].mxu1 %v3178_v41 }
 0x305   :  { %2272 = vmatpush3.bf16.msra.mxu0 %v2566_v24  ;;  %2344 = vmatpush3.bf16.msra.mxu1 %v2567_v25  ;;  %v2245_v46 = vpop.f32.mrb[12].mxu1  ;;  %v2594_v24 = vld [vmem:[#allocation13 + $0x90] ss:$12 sps:$4 sm:$0xff]   ;;  %v2595_v25 = vld [vmem:[#allocation13 + $0x94] ss:$12 sps:$4 sm:$0xff]  }
 0x306   :  { %v579_v47 = vpop.f32.mrb[13].mxu1  ;;  %2273 = vmatprep.subr.bf16.mxu0 %v2568_v44  ;;  %2345 = vmatprep.subr.bf16.mxu1 %v2569_v45 }
 0x307   :  { %v2246_v53 = vpop.f32.mrb[14].mxu1 }
 0x308   :  { %v3186_v54 = vpack.c.bf16 %v2246_v53, %v2245_v46  ;;  %v582_v55 = vpop.f32.mrb[15].mxu1  ;;  %v2610_v46 = vld [vmem:[#allocation11 + $0x98] ss:$12 sps:$4 sm:$0xff]  }
 0x309   :  { %v3188_v58 = vpack.c.bf16 %v582_v55, %v579_v47  ;;  %2274 = vmatpush3.bf16.msra.mxu0 %v2568_v44  ;;  %2346 = vmatpush3.bf16.msra.mxu1 %v2569_v45  ;;  %v2608_v44 = vld [vmem:[#allocation11 + $0x80] ss:$12 sps:$4 sm:$0xff]   ;;  %v2613_v47 = vld [vmem:[#allocation13 + $0xb0] ss:$12 sps:$4 sm:$0xff]   ;;  %v2616_v53 = vld [vmem:[#allocation10 + $0x38] ss:$12 sps:$4 sm:$0xff]  }
 0x30a   :  { %2275 = vmatprep.subr.bf16.mxu0 %v2570_v50  ;;  %2347 = vmatprep.subr.bf16.mxu1 %v2571_v51  ;;  %v2609_v45 = vld [vmem:[#allocation13 + $0x80] ss:$12 sps:$4 sm:$0xff]   ;;  %v2617_v55 = vld [vmem:[#allocation10 + $0x50] ss:$12 sps:$4 sm:$0xff]  }
 0x30b   :  { %2267 = vmatprep.mubr.bf16.mxu0 %v3188_v58  ;;  %2339 = vmatprep.mubr.bf16.mxu1 %v3188_v58 }
 0x30c   :  { %2268 = vmatmul.mubr.bf16.gmra.mrb[20].mxu0 %v3186_v54  ;;  %2340 = vmatmul.mubr.bf16.gmra.mrb[20].mxu1 %v3186_v54 }
 0x30d   :  { %2276 = vmatpush3.bf16.msra.mxu0 %v2570_v50  ;;  %2348 = vmatpush3.bf16.msra.mxu1 %v2571_v51  ;;  %v2614_v50 = vld [vmem:[#allocation10 + $0x8] ss:$12 sps:$4 sm:$0xff]   ;;  %v2615_v51 = vld [vmem:[#allocation10 + $0x20] ss:$12 sps:$4 sm:$0xff]  }
 0x30e   :  { %2287 = vmatprep.mubr.bf16.mxu0 %v3172_v31  ;;  %2359 = vmatprep.mubr.bf16.mxu1 %v3172_v31 }
 0x30f   :  { %2277 = vmatprep.subr.bf16.mxu0 %v2572_v59  ;;  %2349 = vmatprep.subr.bf16.mxu1 %v2573_v63 }
 0x311   :  { %2278 = vmatpush3.bf16.msra.mxu0 %v2572_v59  ;;  %2350 = vmatpush3.bf16.msra.mxu1 %v2573_v63 }
 0x312   :  { %2279 = vmatprep.subr.bf16.mxu0 %v2574_v1  ;;  %2351 = vmatprep.subr.bf16.mxu1 %v2575_v5 }
 0x315   :  { %2280 = vmatpush3.bf16.msra.mxu0 %v2574_v1  ;;  %2352 = vmatpush3.bf16.msra.mxu1 %v2575_v5 }
 0x316   :  { %2281 = vmatprep.subr.bf16.mxu0 %v2576_v6  ;;  %2353 = vmatprep.subr.bf16.mxu1 %v2577_v7 }
 0x319   :  { %2282 = vmatpush3.bf16.msra.mxu0 %v2576_v6  ;;  %2354 = vmatpush3.bf16.msra.mxu1 %v2577_v7 }
 0x31a   :  { %2283 = vmatprep.subr.bf16.mxu0 %v2578_v8  ;;  %2355 = vmatprep.subr.bf16.mxu1 %v2579_v9 }
 0x31d   :  { %2284 = vmatpush3.bf16.msra.mxu0 %v2578_v8  ;;  %2356 = vmatpush3.bf16.msra.mxu1 %v2579_v9 }
 0x31e   :  { %2285 = vmatprep.subr.bf16.mxu0 %v2580_v10  ;;  %2357 = vmatprep.subr.bf16.mxu1 %v2581_v11 }
 0x321   :  { %2286 = vmatpush3.bf16.msra.mxu0 %v2580_v10  ;;  %2358 = vmatpush3.bf16.msra.mxu1 %v2581_v11 }
 0x322   :  { %2295 = vmatprep.subr.bf16.mxu0 %v2582_v12  ;;  %2367 = vmatprep.subr.bf16.mxu1 %v2583_v13 }
 0x324   :  { %2288 = vmatmul.mubr.bf16.vlgmr.msra.gmra.mrb[16].mxu0 %v3170_v29  ;;  %2360 = vmatmul.mubr.bf16.vlgmr.msra.gmra.mrb[16].mxu1 %v3170_v29 }
 0x325   :  { %2291 = vmatprep.mubr.bf16.mxu0 %v3176_v37  ;;  %2296 = vmatpush3.bf16.msra.mxu0 %v2582_v12 }
 0x326   :  { %2363 = vmatprep.mubr.bf16.mxu1 %v3176_v37  ;;  %2368 = vmatpush3.bf16.msra.mxu1 %v2583_v13 }
 0x327   :  { %2297 = vmatprep.subr.bf16.mxu0 %v2584_v14  ;;  %2369 = vmatprep.subr.bf16.mxu1 %v2585_v15 }
 0x329   :  { %2298 = vmatpush3.bf16.msra.mxu0 %v2584_v14 }
 0x32a   :  { %2370 = vmatpush3.bf16.msra.mxu1 %v2585_v15  ;;  %2299 = vmatprep.subr.bf16.mxu0 %v2586_v16 }
 0x32b   :  { %2371 = vmatprep.subr.bf16.mxu1 %v2587_v17 }
 0x32c   :  { %2292 = vmatmul.mubr.bf16.gmra.mrb[20].mxu0 %v3174_v35  ;;  %2364 = vmatmul.mubr.bf16.gmra.mrb[20].mxu1 %v3174_v35 }
 0x32d   :  { %2300 = vmatpush3.bf16.msra.mxu0 %v2586_v16  ;;  %2311 = vmatprep.mubr.bf16.mxu0 %v3123_v52 }
 0x32e   :  { %2372 = vmatpush3.bf16.msra.mxu1 %v2587_v17  ;;  %2383 = vmatprep.mubr.bf16.mxu1 %v3123_v52 }
 0x32f   :  { %2301 = vmatprep.subr.bf16.mxu0 %v2588_v18  ;;  %2373 = vmatprep.subr.bf16.mxu1 %v2589_v19 }
 0x331   :  { %2302 = vmatpush3.bf16.msra.mxu0 %v2588_v18 }
 0x332   :  { %2374 = vmatpush3.bf16.msra.mxu1 %v2589_v19  ;;  %2303 = vmatprep.subr.bf16.mxu0 %v2590_v20 }
 0x333   :  { %2375 = vmatprep.subr.bf16.mxu1 %v2591_v21 }
 0x335   :  { %2304 = vmatpush3.bf16.msra.mxu0 %v2590_v20 }
 0x336   :  { %2376 = vmatpush3.bf16.msra.mxu1 %v2591_v21  ;;  %2305 = vmatprep.subr.bf16.mxu0 %v2592_v22 }
 0x337   :  { %2377 = vmatprep.subr.bf16.mxu1 %v2593_v23 }
 0x339   :  { %2306 = vmatpush3.bf16.msra.mxu0 %v2592_v22 }
 0x33a   :  { %2378 = vmatpush3.bf16.msra.mxu1 %v2593_v23  ;;  %2307 = vmatprep.subr.bf16.mxu0 %v2594_v24 }
 0x33b   :  { %2379 = vmatprep.subr.bf16.mxu1 %v2595_v25 }
 0x33d   :  { %2308 = vmatpush3.bf16.msra.mxu0 %v2594_v24 }
 0x33e   :  { %2380 = vmatpush3.bf16.msra.mxu1 %v2595_v25  ;;  %2309 = vmatprep.subr.bf16.mxu0 %v2596_v26 }
 0x33f   :  { %2381 = vmatprep.subr.bf16.mxu1 %v2597_v27 }
 0x341   :  { %2310 = vmatpush3.bf16.msra.mxu0 %v2596_v26 }
 0x342   :  { %2382 = vmatpush3.bf16.msra.mxu1 %v2597_v27  ;;  %2391 = vmatprep.subr.bf16.mxu0 %v2598_v28 }
 0x343   :  { %2439 = vmatprep.subr.bf16.mxu1 %v2599_v30 }
 0x344   :  { %2312 = vmatmul.mubr.bf16.vlgmr.msra.gmra.mrb[16].mxu0 %v3134_v60 }
 0x345   :  { %2384 = vmatmul.mubr.bf16.vlgmr.msra.gmra.mrb[16].mxu1 %v3134_v60  ;;  %2315 = vmatprep.mubr.bf16.mxu0 %v3145_v0 }
 0x346   :  { %2387 = vmatprep.mubr.bf16.mxu1 %v3145_v0  ;;  %2392 = vmatpush3.bf16.msra.mxu0 %v2598_v28 }
 0x347   :  { %2440 = vmatpush3.bf16.msra.mxu1 %v2599_v30  ;;  %2393 = vmatprep.subr.bf16.mxu0 %v2600_v32 }
 0x348   :  { %2441 = vmatprep.subr.bf16.mxu1 %v2601_v33 }
 0x34a   :  { %2394 = vmatpush3.bf16.msra.mxu0 %v2600_v32 }
 0x34b   :  { %2442 = vmatpush3.bf16.msra.mxu1 %v2601_v33  ;;  %2395 = vmatprep.subr.bf16.mxu0 %v2602_v34 }
 0x34c   :  { %2316 = vmatmul.mubr.bf16.gmra.mrb[20].mxu0 %v3156_v4  ;;  %2443 = vmatprep.subr.bf16.mxu1 %v2603_v36 }
 0x34d   :  { %2388 = vmatmul.mubr.bf16.gmra.mrb[20].mxu1 %v3156_v4  ;;  %2407 = vmatprep.mubr.bf16.mxu0 %v3180_v43  ;;  %v2611_v43 = vld [vmem:[#allocation13 + $0x98] ss:$12 sps:$4 sm:$0xff]  }
 0x34e   :  { %2396 = vmatpush3.bf16.msra.mxu0 %v2602_v34  ;;  %2455 = vmatprep.mubr.bf16.mxu1 %v3123_v52  ;;  %v2612_v52 = vld [vmem:[#allocation11 + $0xb0] ss:$12 sps:$4 sm:$0xff]  }
 0x34f   :  { %2444 = vmatpush3.bf16.msra.mxu1 %v2603_v36  ;;  %2397 = vmatprep.subr.bf16.mxu0 %v2604_v38 }
 0x350   :  { %2445 = vmatprep.subr.bf16.mxu1 %v2605_v39 }
 0x352   :  { %2398 = vmatpush3.bf16.msra.mxu0 %v2604_v38 }
 0x353   :  { %2446 = vmatpush3.bf16.msra.mxu1 %v2605_v39  ;;  %2399 = vmatprep.subr.bf16.mxu0 %v2606_v40 }
 0x354   :  { %2447 = vmatprep.subr.bf16.mxu1 %v2607_v42 }
 0x356   :  { %2400 = vmatpush3.bf16.msra.mxu0 %v2606_v40 }
 0x357   :  { %2448 = vmatpush3.bf16.msra.mxu1 %v2607_v42  ;;  %2401 = vmatprep.subr.bf16.mxu0 %v2608_v44 }
 0x358   :  { %2449 = vmatprep.subr.bf16.mxu1 %v2609_v45 }
 0x35a   :  { %2402 = vmatpush3.bf16.msra.mxu0 %v2608_v44 }
 0x35b   :  { %2450 = vmatpush3.bf16.msra.mxu1 %v2609_v45  ;;  %2403 = vmatprep.subr.bf16.mxu0 %v2610_v46 }
 0x35c   :  { %2451 = vmatprep.subr.bf16.mxu1 %v2611_v43 }
 0x35e   :  { %2404 = vmatpush3.bf16.msra.mxu0 %v2610_v46 }
 0x35f   :  { %2452 = vmatpush3.bf16.msra.mxu1 %v2611_v43  ;;  %2405 = vmatprep.subr.bf16.mxu0 %v2612_v52 }
 0x360   :  { %2453 = vmatprep.subr.bf16.mxu1 %v2613_v47 }
 0x362   :  { %2406 = vmatpush3.bf16.msra.mxu0 %v2612_v52 }
 0x363   :  { %2454 = vmatpush3.bf16.msra.mxu1 %v2613_v47  ;;  %2415 = vmatprep.subr.bf16.mxu0 %v2614_v50  ;;  %v186_v47 = vld [vmem:[%s3312_s7 + $0x4] ss:$0 sm:$0xff] }
 0x365   :  { %2408 = vmatmul.mubr.bf16.vlgmr.msra.gmra.mrb[24].mxu0 %v3178_v41  ;;  %v2618_v41 = vld [vmem:[#allocation10 + $0x68] ss:$12 sps:$4 sm:$0xff]  }
 0x366   :  { %2456 = vmatmul.mubr.bf16.vlgmr.msra.gmra.mrb[24].mxu1 %v3134_v60  ;;  %2411 = vmatprep.mubr.bf16.mxu0 %v3188_v58  ;;  %v2619_v60 = vld [vmem:[#allocation10 + $0x80] ss:$12 sps:$4 sm:$0xff]   ;;  %v2621_v58 = vld [vmem:[#allocation10 + $0xb0] ss:$12 sps:$4 sm:$0xff]  }
 0x367   :  { %2416 = vmatpush3.bf16.msra.mxu0 %v2614_v50  ;;  %2459 = vmatprep.mubr.bf16.mxu1 %v3145_v0  ;;  %v2620_v0 = vld [vmem:[#allocation10 + $0x98] ss:$12 sps:$4 sm:$0xff]  }
 0x368   :  { %2417 = vmatprep.subr.bf16.mxu0 %v2615_v51 }
 0x36b   :  { %2418 = vmatpush3.bf16.msra.mxu0 %v2615_v51 }
 0x36c   :  { %2419 = vmatprep.subr.bf16.mxu0 %v2616_v53 }
 0x36d   :  { %2412 = vmatmul.mubr.bf16.gmra.mrb[28].mxu0 %v3186_v54 }
 0x36e   :  { %2460 = vmatmul.mubr.bf16.gmra.mrb[28].mxu1 %v3156_v4  ;;  %2431 = vmatprep.mubr.bf16.mxu0 %v3172_v31  ;;  %v183_v4 = vld [vmem:[%s3312_s7 + $0x1] ss:$0 sm:$0xff] }
 0x36f   :  { %2420 = vmatpush3.bf16.msra.mxu0 %v2616_v53 }
 0x370   :  { %2421 = vmatprep.subr.bf16.mxu0 %v2617_v55 }
 0x373   :  { %2422 = vmatpush3.bf16.msra.mxu0 %v2617_v55 }
 0x374   :  { %2423 = vmatprep.subr.bf16.mxu0 %v2618_v41 }
 0x377   :  { %2424 = vmatpush3.bf16.msra.mxu0 %v2618_v41 }
 0x378   :  { %2425 = vmatprep.subr.bf16.mxu0 %v2619_v60 }
 0x37b   :  { %2426 = vmatpush3.bf16.msra.mxu0 %v2619_v60 }
 0x37c   :  { %2427 = vmatprep.subr.bf16.mxu0 %v2620_v0 }
 0x37f   :  { %2428 = vmatpush3.bf16.msra.mxu0 %v2620_v0 }
 0x380   :  { %2429 = vmatprep.subr.bf16.mxu0 %v2621_v58 }
 0x383   :  { %2430 = vmatpush3.bf16.msra.mxu0 %v2621_v58 }
 0x386   :  { %2432 = vmatmul.mubr.bf16.vlgmr.msra.gmra.mrb[24].mxu0 %v3170_v29 }
 0x387   :  { %2435 = vmatprep.mubr.bf16.mxu0 %v3176_v37 }
 0x38e   :  { %2436 = vmatmul.mubr.bf16.gmra.mrb[28].mxu0 %v3174_v35 }
 0x417   :  { %v2313_v31 = vpop.f32.mrb[16].mxu0 }
 0x418   :  { %v995_v54 = vadd.f32 %v2313_v31, %v183_v4  ;;  %v3225_v59 = vpop.f32.mrb[16].mxu1  ;;  %v954_v63 = vpop.f32.mrb[17].mxu0 }
 0x419   :  { %v993_v1 = vadd.f32 %v954_v63, %v183_v4  ;;  %v3227_v5 = vpop.f32.mrb[17].mxu1  ;;  %v2314_v6 = vpop.f32.mrb[18].mxu0 }
 0x41a   :  { %v996_v7 = vadd.f32 %v2314_v6, %v183_v4  ;;  %v3229_v8 = vpop.f32.mrb[18].mxu1  ;;  %v957_v29 = vpop.f32.mrb[19].mxu0  ;;  %v2029_v35 = vmul.f32 -1.442695, %v995_v54 }
 0x41b   :  { %v994_v37 = vadd.f32 %v957_v29, %v183_v4  ;;  %v3231_v9 = vpop.f32.mrb[19].mxu1  ;;  %v2027_v10 = vmul.f32 -1.442695, %v993_v1 }
 0x41c   :  { %v2030_v11 = vmul.f32 -1.442695, %v996_v7  ;;  %2638 = vpow2.f32 %v2029_v35 }
 0x41d   :  { %v2028_v12 = vmul.f32 -1.442695, %v994_v37  ;;  %2640 = vpow2.f32 %v2027_v10  ;;  %v184_v37 = vld [vmem:[%s3312_s7 + $0x2] ss:$0 sm:$0xff] }
 0x41e   :  { %2642 = vpow2.f32 %v2030_v11 }
 0x41f   :  { %v2317_v13 = vpop.f32.mrb[20].mxu0  ;;  %2644 = vpow2.f32 %v2028_v12 }
 0x420   :  { %v999_v14 = vadd.f32 %v2317_v13, %v183_v4  ;;  %v3233_v15 = vpop.f32.mrb[20].mxu1  ;;  %v970_v16 = vpop.f32.mrb[21].mxu0 }
 0x421   :  { %v997_v17 = vadd.f32 %v970_v16, %v183_v4  ;;  %v3235_v18 = vpop.f32.mrb[21].mxu1  ;;  %v2318_v19 = vpop.f32.mrb[22].mxu0  ;;  %v1446_v16 = vadd.f32 %v3225_v59, %v184_v37  ;;  %v1445_v59 = vadd.f32 %v3231_v9, %v184_v37 }
 0x422   :  { %v1000_v20 = vadd.f32 %v2318_v19, %v183_v4  ;;  %v3237_v21 = vpop.f32.mrb[22].mxu1  ;;  %v973_v22 = vpop.f32.mrb[23].mxu0  ;;  %v2033_v24 = vmul.f32 -1.442695, %v999_v14 }
 0x423   :  { %v3239_v23 = vpop.f32.mrb[23].mxu1  ;;  %v2031_v25 = vmul.f32 -1.442695, %v997_v17  ;;  %v998_v38 = vadd.f32 %v973_v22, %v183_v4  ;;  %v1444_v22 = vadd.f32 %v3227_v5, %v184_v37 }
 0x424   :  { %v2034_v26 = vmul.f32 -1.442695, %v1000_v20  ;;  %2646 = vpow2.f32 %v2033_v24 }
 0x425   :  { %2648 = vpow2.f32 %v2031_v25  ;;  %v2032_v44 = vmul.f32 -1.442695, %v998_v38  ;;  %v1448_v38 = vadd.f32 %v3235_v18, %v184_v37  ;;  %v185_v18 = vld [vmem:[%s3312_s7 + $0x3] ss:$0 sm:$0xff]  ;;  %s2918_s7 = smov [#allocation14]  }
 0x426   :  { %v2639_v27 = vpop.eup %2638  ;;  %2650 = vpow2.f32 %v2034_v26  ;;  %s1956_s17 = sshll.u32 %s2918_s7, 4  ;;  %s1957_s17 = int_to_ptr.vmem [resolvable:$true] %s1956_s17 }
 0x427   :  { %v2641_v28 = vpop.eup %2640  ;;  %v1027_v33 = vadd.f32 1.0, %v2639_v27  ;;  %s2872_s5 = scalar_lea.vmem %s1957_s17, 1024  ;;  %p2877_p1 = scmp.lt.s32.totalorder %s1957_s17, %s1957_s17 }
 0x428   :  { %v2643_v30 = vpop.eup %2642  ;;  %v1025_v34 = vadd.f32 1.0, %v2641_v28  ;;  %p2873_p0 = scmp.ne.s32.totalorder %s1957_s17, %s2872_s5  ;;  %p2878_p2 = scmp.lt.s32.totalorder %s2872_s5, %s2872_s5 }
 0x429   :  { %v2645_v32 = vpop.eup %2644  ;;  %v1028_v36 = vadd.f32 1.0, %v2643_v30  ;;  %2652 = vrcp.f32 %v1027_v33  ;;  %v2059_v33 = vmul.f32 -1.442695, %v1444_v22 }
 0x42a   :  { %v1026_v39 = vadd.f32 1.0, %v2645_v32  ;;  %2654 = vrcp.f32 %v1025_v34  ;;  %v2061_v32 = vmul.f32 -1.442695, %v1446_v16  ;;  %v1447_v34 = vadd.f32 %v3229_v8, %v184_v37  ;;  %p2879_p3 = por %p2878_p2, %p2877_p1 }
 0x42b   :  { %2656 = vrcp.f32 %v1028_v36  ;;  %v1450_v36 = vadd.f32 %v3233_v15, %v184_v37  ;;  %v1449_v8 = vadd.f32 %v3239_v23, %v184_v37 }
 0x42c   :  { %2658 = vrcp.f32 %v1026_v39  ;;  %v2062_v39 = vmul.f32 -1.442695, %v1447_v34  ;;  %p2880_p4 = pnand %p2879_p3, %p2873_p0 }
 0x42d   :  { %2660 = vpow2.f32 %v2032_v44  ;;  %v2065_v44 = vmul.f32 -1.442695, %v1450_v36 }
 0x42e   :  { %v2647_v40 = vpop.eup %2646 }
 0x42f   :  { %v2649_v42 = vpop.eup %2648  ;;  %v1031_v46 = vadd.f32 1.0, %v2647_v40 }
 0x430   :  { %v2651_v45 = vpop.eup %2650  ;;  %v1029_v43 = vadd.f32 1.0, %v2649_v42  ;;  %v2060_v42 = vmul.f32 -1.442695, %v1445_v59 }
 0x431   :  { %v1032_v52 = vadd.f32 1.0, %v2651_v45  ;;  %2662 = vrcp.f32 %v1031_v46  ;;  %v2063_v46 = vmul.f32 -1.442695, %v1448_v38 }
 0x432   :  { %2664 = vrcp.f32 %v1029_v43  ;;  %v1451_v43 = vadd.f32 %v3237_v21, %v184_v37 }
 0x433   :  { %v2653_v55 = vpop.eup %2652  ;;  %2666 = vrcp.f32 %v1032_v52 }
 0x434   :  { %v2655_v0 = vpop.eup %2654  ;;  %v2066_v15 = vmul.f32 -1.442695, %v1451_v43 }
 0x435   :  { %v2657_v54 = vpop.eup %2656 }
 0x436   :  { %v2659_v6 = vpop.eup %2658 }
 0x437   :  { %v2661_v35 = vpop.eup %2660 }
 0x438   :  { %v1030_v11 = vadd.f32 1.0, %v2661_v35 }
 0x439   :  { %v2457_v50 = vpop.f32.mrb[24].mxu1 }
 0x43a   :  { %v1873_v51 = vadd.f32 %v2457_v50, %v186_v47  ;;  %v1864_v53 = vpop.f32.mrb[25].mxu1  ;;  %2668 = vrcp.f32 %v1030_v11 }
 0x43b   :  { %v1865_v41 = vadd.f32 %v1864_v53, %v186_v47  ;;  %v2458_v60 = vpop.f32.mrb[26].mxu1  ;;  %v2663_v14 = vpop.eup %2662  ;;  %2670 = vpow2.f32 %v2061_v32 }
 0x43c   :  { %v3244_v58 = vmul.f32 %v2653_v55, %v1873_v51  ;;  %v1876_v4 = vadd.f32 %v2458_v60, %v186_v47  ;;  %v1867_v31 = vpop.f32.mrb[27].mxu1  ;;  %v2665_v20 = vpop.eup %2664  ;;  %2672 = vpow2.f32 %v2059_v33 }
 0x43d   :  { %v3246_v63 = vmul.f32 %v2655_v0, %v1865_v41  ;;  %v1868_v1 = vadd.f32 %v1867_v31, %v186_v47  ;;  %v2667_v27 = vpop.eup %2666  ;;  %2674 = vpow2.f32 %v2062_v39 }
 0x43e   :  { %v3248_v7 = vmul.f32 %v2657_v54, %v1876_v4  ;;  %2676 = vpow2.f32 %v2060_v42 }
 0x43f   :  { %v3250_v29 = vmul.f32 %v2659_v6, %v1868_v1  ;;  %2678 = vpow2.f32 %v2065_v44 }
 0x440   :  { %2680 = vpow2.f32 %v2063_v46 }
 0x441   :  { %v2461_v10 = vpop.f32.mrb[28].mxu1  ;;  %2682 = vpow2.f32 %v2066_v15 }
 0x442   :  { %v1889_v12 = vadd.f32 %v2461_v10, %v186_v47  ;;  %v1880_v13 = vpop.f32.mrb[29].mxu1 }
 0x443   :  { %v1881_v17 = vadd.f32 %v1880_v13, %v186_v47  ;;  %v2462_v19 = vpop.f32.mrb[30].mxu1 }
 0x444   :  { %v3257_v24 = vmul.f32 %v2663_v14, %v1889_v12  ;;  %v1892_v25 = vadd.f32 %v2462_v19, %v186_v47  ;;  %v1883_v26 = vpop.f32.mrb[31].mxu1  ;;  %v2669_v40 = vpop.eup %2668 }
 0x445   :  { %v3259_v28 = vmul.f32 %v2665_v20, %v1881_v17  ;;  %v1884_v5 = vadd.f32 %v1883_v26, %v186_v47  ;;  %v2671_v9 = vpop.eup %2670  ;;  %v2064_v47 = vmul.f32 -1.442695, %v1449_v8 }
 0x446   :  { %v3261_v30 = vmul.f32 %v2667_v27, %v1892_v25  ;;  %v2673_v52 = vpop.eup %2672  ;;  %v1478_v50 = vadd.f32 1.0, %v2671_v9 }
 0x447   :  { %v3267_v45 = vmul.f32 %v2669_v40, %v1884_v5  ;;  %v1476_v51 = vadd.f32 1.0, %v2673_v52  ;;  %2684 = vpow2.f32 %v2064_v47  ;;  %v2675_v41 = vpop.eup %2674 }
 0x448   :  { %v2677_v0 = vpop.eup %2676  ;;  %2686 = vrcp.f32 %v1478_v50  ;;  %v1479_v10 = vadd.f32 1.0, %v2675_v41 }
 0x449   :  { %v2679_v1 = vpop.eup %2678  ;;  %2688 = vrcp.f32 %v1476_v51  ;;  %v1477_v12 = vadd.f32 1.0, %v2677_v0 }
 0x44a   :  { %v2681_v35 = vpop.eup %2680  ;;  %v1482_v14 = vadd.f32 1.0, %v2679_v1 }
 0x44b   :  { %v1480_v16 = vadd.f32 1.0, %v2681_v35  ;;  %v2683_v20 = vpop.eup %2682 }
 0x44c   :  { %v1483_v34 = vadd.f32 1.0, %v2683_v20 }
 0x451   :  { %v2685_v25 = vpop.eup %2684 }
 0x452   :  { %v2687_v33 = vpop.eup %2686  ;;  %v1481_v5 = vadd.f32 1.0, %v2685_v25 }
 0x453   :  { %v2689_v36 = vpop.eup %2688 }
 0x459   :  { %v2433_v53 = vpop.f32.mrb[24].mxu0 }
 0x45a   :  { %v1760_v55 = vadd.f32 %v2433_v53, %v185_v18  ;;  %v1727_v21 = vpop.f32.mrb[25].mxu0 }
 0x45b   :  { %v1758_v60 = vadd.f32 %v1727_v21, %v185_v18  ;;  %v2434_v23 = vpop.f32.mrb[26].mxu0 }
 0x45c   :  { %v1905_v4 = vadd.f32 %v3244_v58, %v1760_v55  ;;  %v1761_v31 = vadd.f32 %v2434_v23, %v185_v18  ;;  %v1730_v54 = vpop.f32.mrb[27].mxu0 }
 0x45d   :  { %v1903_v6 = vadd.f32 %v3246_v63, %v1758_v60  ;;  %v1759_v37 = vadd.f32 %v1730_v54, %v185_v18 }
 0x45e   :  { %2690 = vtanh.f32 %v1905_v4  ;;  %v1906_v11 = vadd.f32 %v3248_v7, %v1761_v31 }
 0x45f   :  { %2692 = vtanh.f32 %v1903_v6  ;;  %v1904_v13 = vadd.f32 %v3250_v29, %v1759_v37 }
 0x460   :  { %2694 = vtanh.f32 %v1906_v11 }
 0x461   :  { %2696 = vtanh.f32 %v1904_v13  ;;  %v2437_v58 = vpop.f32.mrb[28].mxu0 }
 0x462   :  { %2698 = vrcp.f32 %v1479_v10  ;;  %v1764_v17 = vadd.f32 %v2437_v58, %v185_v18  ;;  %v1743_v19 = vpop.f32.mrb[29].mxu0 }
 0x463   :  { %2700 = vrcp.f32 %v1477_v12  ;;  %v1762_v63 = vadd.f32 %v1743_v19, %v185_v18  ;;  %v2438_v22 = vpop.f32.mrb[30].mxu0 }
 0x464   :  { %2702 = vrcp.f32 %v1482_v14  ;;  %v1909_v7 = vadd.f32 %v3257_v24, %v1764_v17  ;;  %v1765_v26 = vadd.f32 %v2438_v22, %v185_v18  ;;  %v1746_v27 = vpop.f32.mrb[31].mxu0 }
 0x465   :  { %2704 = vrcp.f32 %v1480_v16  ;;  %v1907_v29 = vadd.f32 %v3259_v28, %v1762_v63  ;;  %v1763_v32 = vadd.f32 %v1746_v27, %v185_v18 }
 0x466   :  { %2706 = vtanh.f32 %v1909_v7  ;;  %v1910_v59 = vadd.f32 %v3261_v30, %v1765_v26 }
 0x467   :  { %2708 = vtanh.f32 %v1907_v29  ;;  %v1908_v38 = vadd.f32 %v3267_v45, %v1763_v32 }
 0x468   :  { %v2691_v39 = vpop.eup %2690  ;;  %2710 = vtanh.f32 %v1910_v59 }
 0x469   :  { %v2693_v40 = vpop.eup %2692  ;;  %v1921_v24 = vsub.f32 %v3127_v56, %v2691_v39  ;;  %2712 = vtanh.f32 %v1908_v38 }
 0x46a   :  { %v2695_v42 = vpop.eup %2694  ;;  %2714 = vrcp.f32 %v1483_v34  ;;  %v1919_v28 = vsub.f32 %v3116_v48, %v2693_v40 }
 0x46b   :  { %v2697_v44 = vpop.eup %2696  ;;  %2716 = vrcp.f32 %v1481_v5  ;;  %v1929_v46 = vmul.f32 %v2687_v33, %v1921_v24  ;;  %v1922_v30 = vsub.f32 %v3130_v57, %v2695_v42 }
 0x46c   :  { %v2699_v43 = vpop.eup %2698  ;;  %v1927_v8 = vmul.f32 %v2689_v36, %v1919_v28  ;;  %v1920_v9 = vsub.f32 %v3119_v49, %v2697_v44 }
 0x46d   :  { %v2701_v45 = vpop.eup %2700  ;;  %v1937_v15 = vadd.f32 %v2691_v39, %v1929_v46  ;;  %v1930_v52 = vmul.f32 %v2699_v43, %v1922_v30 }
 0x46e   :  { %v2703_v47 = vpop.eup %2702  ;;  %v1935_v18 = vadd.f32 %v2693_v40, %v1927_v8  ;;  %v1928_v56 = vmul.f32 %v2701_v45, %v1920_v9 }
 0x46f   :  { %v2705_v50 = vpop.eup %2704  ;;  %1945 = vst [vmem:[#allocation14 + $0x10] sm:$0xff] %v1937_v15  ;;  %v1938_v51 = vadd.f32 %v2695_v42, %v1930_v52 }
 0x470   :  { %v2707_v53 = vpop.eup %2706  ;;  %1943 = vst [vmem:[#allocation14] sm:$0xff] %v1935_v18  ;;  %v1936_v48 = vadd.f32 %v2697_v44, %v1928_v56 }
 0x471   :  { %v2709_v55 = vpop.eup %2708  ;;  %1946 = vst [vmem:[#allocation14 + $0x18] sm:$0xff] %v1938_v51  ;;  %v1925_v57 = vsub.f32 %v3149_v2, %v2707_v53 }
 0x472   :  { %v2711_v21 = vpop.eup %2710  ;;  %1944 = vst [vmem:[#allocation14 + $0x8] sm:$0xff] %v1936_v48  ;;  %v1923_v49 = vsub.f32 %v3138_v61, %v2709_v55 }
 0x473   :  { %v2713_v41 = vpop.eup %2712  ;;  %v1933_v60 = vmul.f32 %v2703_v47, %v1925_v57  ;;  %v1926_v23 = vsub.f32 %v3152_v3, %v2711_v21 }
 0x474   :  { %v2715_v0 = vpop.eup %2714  ;;  %v1931_v4 = vmul.f32 %v2705_v50, %v1923_v49  ;;  %v1924_v31 = vsub.f32 %v3141_v62, %v2713_v41 }
 0x475   :  { %v2717_v54 = vpop.eup %2716  ;;  %v1941_v1 = vadd.f32 %v2707_v53, %v1933_v60  ;;  %v1934_v6 = vmul.f32 %v2715_v0, %v1926_v23 }
 0x476   :  { %v1939_v37 = vadd.f32 %v2709_v55, %v1931_v4  ;;  %v1932_v35 = vmul.f32 %v2717_v54, %v1924_v31 }
 0x477   :  { %1949 = vst [vmem:[#allocation14 + $0x30] sm:$0xff] %v1941_v1  ;;  %v1942_v2 = vadd.f32 %v2711_v21, %v1934_v6 }
 0x478   :  { %1947 = vst [vmem:[#allocation14 + $0x20] sm:$0xff] %v1939_v37  ;;  %v1940_v10 = vadd.f32 %v2713_v41, %v1932_v35 }
 0x479   :  { %1950 = vst [vmem:[#allocation14 + $0x38] sm:$0xff] %v1942_v2 }
 0x47a   :  { %1948 = vst [vmem:[#allocation14 + $0x28] sm:$0xff] %v1940_v10 }
 0x47b   :  { %2883 = shalt.err (!%p2880_p4)
}
 0x47c   :  { %s2884_s18 = scalar_lea.hbm %s3313_s8, 1024 }
 0x47d   :  { %p2885_p5 = scmp.ne.s32.totalorder %s3313_s8, %s2884_s18  ;;  %p2888_p6 = scmp.lt.u32.totalorder %s2884_s18, %s3313_s8 }
 0x47f   :  { %p2890_p7 = pnand %p2888_p6, %p2885_p5 }
 0x481   :  { %2893 = shalt.err (!%p2890_p7)
}
 0x482   :  { %1962 = dma.vmem_to_hbm [thread:$0]  %s1957_s17, 1024, %s3313_s8, [#allocation4], %s2908_s1, %s2908_s1, %s2909_s28  }
 0x483   :  { %2902 = dma.done.wait [#allocation4], 1024  }
 0x484   :  { %2903 = vsyncadd [#allocation4], 4294966272 }
 0x485   :  { %1966 = vsyncpa [#allocation3], 1 }
 0x486   :  { %1967 = vsyncpa [#allocation6], 1 }
 0x487   :  { %1968 = vsyncpa [#allocation9], 1 }
 0x488   :  { %1969 = vsyncpa [#allocation12], 1 }
 0x489   :  { %1970 = vsyncpa [#allocation4], 1 }

</bundles_post_ra>
